<compile_context>
chip_gen: v7x
topology: tpu7x:2x2x1
jax: 0.10.0
libtpu: 0.0.40
codegen_flags: <defaults>
</compile_context>

<pallas_src>
import math
import jax
import jax.numpy as jnp
from jax.experimental import pallas as pl
from jax.experimental.pallas import tpu as pltpu

# ---- small synthetic ALBERT config ----
B = 2            # batch
S = 8            # sequence length
H = 32           # hidden size
NH = 2           # attention heads
DH = H // NH     # head dim
FF = 64          # ffn intermediate size
L = 12           # albert layers (weights shared)
NCLS = 4         # number of [CLS] sentence positions
N = B * NCLS     # total CLS rows
VOCAB = 100
ATTN_DIM = 32    # layer-attention dim in encoder stand-in
EPS = 1e-12


def _ln(x, g, b):
    mu = jnp.mean(x, axis=-1, keepdims=True)
    var = jnp.mean((x - mu) ** 2, axis=-1, keepdims=True)
    return (x - mu) * jax.lax.rsqrt(var + EPS) * g + b


_LAYER_W_NAMES = ("wq", "bq", "wk", "bk", "wv", "bv", "wo", "bo",
                  "g1", "be1", "w1", "bf1", "w2", "bf2", "g2", "be2")
_HEAD_W_NAMES = ("wa", "ba", "va", "sw", "sb")


# ------------------------------------------------------------------
# Single fused kernel: 12 shared-weight layers + CLS gather + head
# ------------------------------------------------------------------
def fused_summarizer_kernel(x0_ref, bias_ref, sel_ref, mcls_ref,
                            wq_ref, bq_ref, wk_ref, bk_ref, wv_ref, bv_ref,
                            wo_ref, bo_ref, g1_ref, be1_ref,
                            w1_ref, bf1_ref, w2_ref, bf2_ref, g2_ref, be2_ref,
                            wa_ref, ba_ref, va_ref, sw_ref, sb_ref,
                            o_ref,
                            h_ref, cls_ref):
    l = pl.program_id(0)

    # ---- layer input: embeddings at l == 0, previous layer output otherwise
    @pl.when(l == 0)
    def _():
        h_ref[...] = x0_ref[...]

    x = h_ref[...]                                          # (B*S, H)

    # ---- self-attention (whole batch in one block, block-diag mask)
    q = jnp.dot(x, wq_ref[...], preferred_element_type=jnp.float32) + bq_ref[...]
    k = jnp.dot(x, wk_ref[...], preferred_element_type=jnp.float32) + bk_ref[...]
    v = jnp.dot(x, wv_ref[...], preferred_element_type=jnp.float32) + bv_ref[...]

    scale = 1.0 / math.sqrt(DH)
    bias = bias_ref[...]                                    # (B*S, B*S) additive
    heads = []
    for hh in range(NH):                                    # static, NH = 2
        sl = slice(hh * DH, (hh + 1) * DH)
        s = jnp.dot(q[:, sl], k[:, sl].T,
                    preferred_element_type=jnp.float32) * scale + bias
        s = s - jnp.max(s, axis=-1, keepdims=True)
        p = jnp.exp(s)
        p = p * pl.reciprocal(jnp.sum(p, axis=-1, keepdims=True), approx=True)
        heads.append(jnp.dot(p, v[:, sl], preferred_element_type=jnp.float32))
    attn = jnp.concatenate(heads, axis=-1)                  # (B*S, H)

    ctx = jnp.dot(attn, wo_ref[...], preferred_element_type=jnp.float32) + bo_ref[...]
    h1 = _ln(x + ctx, g1_ref[...], be1_ref[...])            # post-LN (BERT/ALBERT)
    ff = jax.nn.gelu(
        jnp.dot(h1, w1_ref[...], preferred_element_type=jnp.float32) + bf1_ref[...],
        approximate=True)
    ff2 = jnp.dot(ff, w2_ref[...], preferred_element_type=jnp.float32) + bf2_ref[...]
    hout = _ln(h1 + ff2, g2_ref[...], be2_ref[...])
    h_ref[...] = hout                                       # carry to next layer

    # ---- per-layer CLS gather via one-hot matmul; stays in VMEM scratch
    cls_vecs = jnp.dot(sel_ref[...], hout,
                       preferred_element_type=jnp.float32)  # (N, H)
    start = pl.multiple_of(l * N, N)
    cls_ref[pl.ds(start, N), :] = cls_vecs                  # rows [l*N, l*N+N)

    # ---- summarizer head at the final layer (only HBM output of the kernel)
    @pl.when(l == pl.num_programs(0) - 1)
    def _():
        sents_flat = cls_ref[...]                           # (L*N, H)
        mc = mcls_ref[...]                                  # (N, 1)

        # TODO(synk): RNNEncoder_attn stand-in — attention pooling over layers.
        a = jnp.tanh(jnp.dot(sents_flat, wa_ref[...],
                             preferred_element_type=jnp.float32) + ba_ref[...])
        logit = jnp.dot(a, va_ref[...],
                        preferred_element_type=jnp.float32)  # (L*N, 1)
        logit = logit.reshape(L, N, 1)
        logit = logit - jnp.max(logit, axis=0, keepdims=True)
        wexp = jnp.exp(logit)
        w = wexp * pl.reciprocal(jnp.sum(wexp, axis=0, keepdims=True), approx=True)

        sents = sents_flat.reshape(L, N, H)                 # (L, N, H)
        pooled = jnp.sum(w * sents, axis=0)                 # (N, H)
        last = sents[L - 1]                                 # final hidden at CLS

        cat = jnp.concatenate([pooled, last], axis=-1) * mc  # (N, 2H), mask
        score = jnp.dot(cat, sw_ref[...],
                        preferred_element_type=jnp.float32) + sb_ref[...]
        o_ref[...] = jax.nn.sigmoid(score) * mc             # (N, 1)


def fused_summarizer(x0, bias, sel, mcls, params):
    layer_w = [params[n] for n in _LAYER_W_NAMES]
    head_w = [params[n] for n in _HEAD_W_NAMES]
    operands = [x0, bias, sel, mcls] + layer_w + head_w
    # All operands are full-array blocks with constant index maps -> they are
    # DMA'd once and stay resident in VMEM across the 12 layer grid steps.
    in_specs = [pl.BlockSpec(op.shape, lambda l, _nd=op.ndim: (0,) * _nd)
                for op in operands]
    return pl.pallas_call(
        fused_summarizer_kernel,
        out_shape=jax.ShapeDtypeStruct((N, 1), jnp.float32),
        grid=(L,),
        in_specs=in_specs,
        out_specs=pl.BlockSpec((N, 1), lambda l: (0, 0)),
        scratch_shapes=[pltpu.VMEM((B * S, H), jnp.float32),    # hidden carry
                        pltpu.VMEM((L * N, H), jnp.float32)],   # per-layer CLS
        compiler_params=pltpu.CompilerParams(
            dimension_semantics=("arbitrary",)),                # layers are sequential
    )(*operands)


# ------------------------------------------------------------------
# Full forward (glue: embeddings, mask/selector construction, reshapes)
# ------------------------------------------------------------------
def albert_summarizer_forward(params, x, segs, clss, mask, mask_cls):
    # embeddings (glue, XLA)
    emb = (params["word_emb"][x]
           + params["pos_emb"][None, :, :]
           + params["type_emb"][segs])
    emb = _ln(emb, params["emb_g"], params["emb_b"])              # (B, S, H)
    x0 = emb.reshape(B * S, H)

    # additive attention bias: block-diagonal over batch + key-padding mask
    same = jnp.eye(B, dtype=jnp.float32)[:, None, :, None]        # (B,1,B,1)
    keym = mask.astype(jnp.float32)[None, None, :, :]             # (1,1,B,S)
    allow = jnp.broadcast_to(same * keym, (B, S, B, S)).reshape(B * S, B * S)
    bias = (allow - 1.0) * 1e9                                    # 0 keep / -1e9 drop

    # one-hot CLS selection matrix: sel @ h_flat == h[b, clss[b,c], :]
    rows = jnp.arange(B * NCLS)
    cols = (jnp.arange(B)[:, None] * S + clss).reshape(B * NCLS)
    sel = jnp.zeros((B * NCLS, B * S), jnp.float32).at[rows, cols].set(1.0)

    mcls = mask_cls.astype(jnp.float32).reshape(B * NCLS, 1)

    scores = fused_summarizer(x0, bias, sel, mcls, params)        # (B*NCLS, 1)
    return scores.reshape(B, NCLS), mask_cls                      # (B, NCLS), (B, NCLS)


# ------------------------------------------------------------------
# Deterministic parameter init (synthetic; mirrors module shapes/intent)
# ------------------------------------------------------------------
def init_params(key):
    ks = iter(jax.random.split(key, 16))

    def u(shape, scale):
        return jax.random.uniform(next(ks), shape, jnp.float32, -1.0, 1.0) * scale

    p = {}
    p["word_emb"] = u((VOCAB, H), 0.02)
    p["pos_emb"] = u((S, H), 0.02)
    p["type_emb"] = u((2, H), 0.02)
    p["emb_g"], p["emb_b"] = jnp.ones((1, H)), jnp.zeros((1, H))

    for name, shape in [("wq", (H, H)), ("wk", (H, H)), ("wv", (H, H)),
                        ("wo", (H, H)), ("w1", (H, FF)), ("w2", (FF, H))]:
        p[name] = u(shape, 0.05)
    for name, shape in [("bq", (1, H)), ("bk", (1, H)), ("bv", (1, H)),
                        ("bo", (1, H)), ("bf1", (1, FF)), ("bf2", (1, H))]:
        p[name] = jnp.zeros(shape, jnp.float32)
    p["g1"], p["be1"] = jnp.ones((1, H)), jnp.zeros((1, H))
    p["g2"], p["be2"] = jnp.ones((1, H)), jnp.zeros((1, H))

    # encoder stand-in + score head (uniform init, like param_init in the module)
    p["wa"] = u((H, ATTN_DIM), 0.1)
    p["ba"] = jnp.zeros((1, ATTN_DIM), jnp.float32)
    p["va"] = u((ATTN_DIM, 1), 0.1)
    p["sw"] = u((2 * H, 1), 0.1)                 # nn.Linear(hidden*2, 1)
    p["sb"] = jnp.zeros((1, 1), jnp.float32)
    return p


if __name__ == "__main__":
    key = jax.random.PRNGKey(0)
    kp, kx, kseg = jax.random.split(key, 3)
    params = init_params(kp)

    x = jax.random.randint(kx, (B, S), 0, VOCAB, dtype=jnp.int32)
    segs = jax.random.randint(kseg, (B, S), 0, 2, dtype=jnp.int32)
    clss = jnp.array([[0, 2, 4, 6],
                      [0, 3, 5, 7]], dtype=jnp.int32)
    mask = jnp.array([[1, 1, 1, 1, 1, 1, 1, 1],
                      [1, 1, 1, 1, 1, 1, 0, 0]], dtype=jnp.float32)
    mask_cls = jnp.array([[1, 1, 1, 1],
                          [1, 1, 1, 0]], dtype=jnp.float32)

    sent_scores, out_mask_cls = albert_summarizer_forward(
        params, x, segs, clss, mask, mask_cls)
    jax.block_until_ready(sent_scores)
    jax.block_until_ready(out_mask_cls)
    assert sent_scores.shape == (B, NCLS)
    assert out_mask_cls.shape == (B, NCLS)
    print("KERNEL_OK")
</pallas_src>

<mosaic_0001>
module attributes {stable_mosaic.version = 11 : i64} {
  func.func @fused_summarizer_kernel(%arg0: i32, %arg1: memref<16x32xf32, #tpu.memory_space<vmem>>, %arg2: memref<16x16xf32, #tpu.memory_space<vmem>>, %arg3: memref<8x16xf32, #tpu.memory_space<vmem>>, %arg4: memref<8x1xf32, #tpu.memory_space<vmem>>, %arg5: memref<32x32xf32, #tpu.memory_space<vmem>>, %arg6: memref<1x32xf32, #tpu.memory_space<vmem>>, %arg7: memref<32x32xf32, #tpu.memory_space<vmem>>, %arg8: memref<1x32xf32, #tpu.memory_space<vmem>>, %arg9: memref<32x32xf32, #tpu.memory_space<vmem>>, %arg10: memref<1x32xf32, #tpu.memory_space<vmem>>, %arg11: memref<32x32xf32, #tpu.memory_space<vmem>>, %arg12: memref<1x32xf32, #tpu.memory_space<vmem>>, %arg13: memref<1x32xf32, #tpu.memory_space<vmem>>, %arg14: memref<1x32xf32, #tpu.memory_space<vmem>>, %arg15: memref<32x64xf32, #tpu.memory_space<vmem>>, %arg16: memref<1x64xf32, #tpu.memory_space<vmem>>, %arg17: memref<64x32xf32, #tpu.memory_space<vmem>>, %arg18: memref<1x32xf32, #tpu.memory_space<vmem>>, %arg19: memref<1x32xf32, #tpu.memory_space<vmem>>, %arg20: memref<1x32xf32, #tpu.memory_space<vmem>>, %arg21: memref<32x32xf32, #tpu.memory_space<vmem>>, %arg22: memref<1x32xf32, #tpu.memory_space<vmem>>, %arg23: memref<32x1xf32, #tpu.memory_space<vmem>>, %arg24: memref<64x1xf32, #tpu.memory_space<vmem>>, %arg25: memref<1x1xf32, #tpu.memory_space<vmem>>, %arg26: memref<8x1xf32, #tpu.memory_space<vmem>>, %arg27: memref<16x32xf32, #tpu.memory_space<vmem>>, %arg28: memref<96x32xf32, #tpu.memory_space<vmem>>) attributes {dimension_semantics = [#tpu.dimension_semantics<arbitrary>], iteration_bounds = array<i64: 12>, scalar_prefetch = 0 : i64, scratch_operands = 2 : i64, tpu.core_type = #tpu.core_type<tc>, window_params = [{pipeline_mode = #tpu.pipeline_mode<synchronous>, transform_indices = @transform_0, window_bounds = array<i64: 16, 32>}, {pipeline_mode = #tpu.pipeline_mode<synchronous>, transform_indices = @transform_1, window_bounds = array<i64: 16, 16>}, {pipeline_mode = #tpu.pipeline_mode<synchronous>, transform_indices = @transform_2, window_bounds = array<i64: 8, 16>}, {pipeline_mode = #tpu.pipeline_mode<synchronous>, transform_indices = @transform_3, window_bounds = array<i64: 8, 1>}, {pipeline_mode = #tpu.pipeline_mode<synchronous>, transform_indices = @transform_4, window_bounds = array<i64: 32, 32>}, {pipeline_mode = #tpu.pipeline_mode<synchronous>, transform_indices = @transform_5, window_bounds = array<i64: 1, 32>}, {pipeline_mode = #tpu.pipeline_mode<synchronous>, transform_indices = @transform_6, window_bounds = array<i64: 32, 32>}, {pipeline_mode = #tpu.pipeline_mode<synchronous>, transform_indices = @transform_7, window_bounds = array<i64: 1, 32>}, {pipeline_mode = #tpu.pipeline_mode<synchronous>, transform_indices = @transform_8, window_bounds = array<i64: 32, 32>}, {pipeline_mode = #tpu.pipeline_mode<synchronous>, transform_indices = @transform_9, window_bounds = array<i64: 1, 32>}, {pipeline_mode = #tpu.pipeline_mode<synchronous>, transform_indices = @transform_10, window_bounds = array<i64: 32, 32>}, {pipeline_mode = #tpu.pipeline_mode<synchronous>, transform_indices = @transform_11, window_bounds = array<i64: 1, 32>}, {pipeline_mode = #tpu.pipeline_mode<synchronous>, transform_indices = @transform_12, window_bounds = array<i64: 1, 32>}, {pipeline_mode = #tpu.pipeline_mode<synchronous>, transform_indices = @transform_13, window_bounds = array<i64: 1, 32>}, {pipeline_mode = #tpu.pipeline_mode<synchronous>, transform_indices = @transform_14, window_bounds = array<i64: 32, 64>}, {pipeline_mode = #tpu.pipeline_mode<synchronous>, transform_indices = @transform_15, window_bounds = array<i64: 1, 64>}, {pipeline_mode = #tpu.pipeline_mode<synchronous>, transform_indices = @transform_16, window_bounds = array<i64: 64, 32>}, {pipeline_mode = #tpu.pipeline_mode<synchronous>, transform_indices = @transform_17, window_bounds = array<i64: 1, 32>}, {pipeline_mode = #tpu.pipeline_mode<synchronous>, transform_indices = @transform_18, window_bounds = array<i64: 1, 32>}, {pipeline_mode = #tpu.pipeline_mode<synchronous>, transform_indices = @transform_19, window_bounds = array<i64: 1, 32>}, {pipeline_mode = #tpu.pipeline_mode<synchronous>, transform_indices = @transform_20, window_bounds = array<i64: 32, 32>}, {pipeline_mode = #tpu.pipeline_mode<synchronous>, transform_indices = @transform_21, window_bounds = array<i64: 1, 32>}, {pipeline_mode = #tpu.pipeline_mode<synchronous>, transform_indices = @transform_22, window_bounds = array<i64: 32, 1>}, {pipeline_mode = #tpu.pipeline_mode<synchronous>, transform_indices = @transform_23, window_bounds = array<i64: 64, 1>}, {pipeline_mode = #tpu.pipeline_mode<synchronous>, transform_indices = @transform_24, window_bounds = array<i64: 1, 1>}, {pipeline_mode = #tpu.pipeline_mode<synchronous>, transform_indices = @transform_25, window_bounds = array<i64: 8, 1>}]} {
    %c0_i32 = arith.constant 0 : i32
    %0 = arith.cmpi eq, %arg0, %c0_i32 : i32
    %1 = arith.extui %0 : i1 to i32
    %c0_i32_0 = arith.constant 0 : i32
    %2 = arith.cmpi ne, %1, %c0_i32_0 : i32
    scf.if %2 {
      %c0_72 = arith.constant 0 : index
      %c0_73 = arith.constant 0 : index
      %147 = vector.load %arg1[%c0_72, %c0_73] : memref<16x32xf32, #tpu.memory_space<vmem>>, vector<16x32xf32>
      %c0_74 = arith.constant 0 : index
      %c0_75 = arith.constant 0 : index
      %148 = vector.load %arg27[%c0_74, %c0_75] : memref<16x32xf32, #tpu.memory_space<vmem>>, vector<16x32xf32>
      tpu.vector_store %arg27[%c0_74, %c0_75], %147 {strides = array<i32>} : memref<16x32xf32, #tpu.memory_space<vmem>>, vector<16x32xf32>,
    } else {
    }
    %c0 = arith.constant 0 : index
    %c0_1 = arith.constant 0 : index
    %3 = vector.load %arg27[%c0, %c0_1] : memref<16x32xf32, #tpu.memory_space<vmem>>, vector<16x32xf32>
    %c0_2 = arith.constant 0 : index
    %c0_3 = arith.constant 0 : index
    %4 = vector.load %arg5[%c0_2, %c0_3] : memref<32x32xf32, #tpu.memory_space<vmem>>, vector<32x32xf32>
    %cst = arith.constant dense<0.000000e+00> : vector<16x32xf32>
    %5 = tpu.matmul %3, %4, %cst {dimension_numbers = #tpu.dot_dimension_numbers<[1], [0], [0], [1], [0, 0, 1, 1], [], []>} : vector<16x32xf32>, vector<32x32xf32>, vector<16x32xf32> -> vector<16x32xf32>
    %c0_4 = arith.constant 0 : index
    %c0_5 = arith.constant 0 : index
    %6 = vector.load %arg6[%c0_4, %c0_5] : memref<1x32xf32, #tpu.memory_space<vmem>>, vector<1x32xf32>
    %7 = vector.broadcast %6 : vector<1x32xf32> to vector<16x32xf32>
    %8 = arith.addf %5, %7 : vector<16x32xf32>
    %c0_6 = arith.constant 0 : index
    %c0_7 = arith.constant 0 : index
    %9 = vector.load %arg7[%c0_6, %c0_7] : memref<32x32xf32, #tpu.memory_space<vmem>>, vector<32x32xf32>
    %cst_8 = arith.constant dense<0.000000e+00> : vector<16x32xf32>
    %10 = tpu.matmul %3, %9, %cst_8 {dimension_numbers = #tpu.dot_dimension_numbers<[1], [0], [0], [1], [0, 0, 1, 1], [], []>} : vector<16x32xf32>, vector<32x32xf32>, vector<16x32xf32> -> vector<16x32xf32>
    %c0_9 = arith.constant 0 : index
    %c0_10 = arith.constant 0 : index
    %11 = vector.load %arg8[%c0_9, %c0_10] : memref<1x32xf32, #tpu.memory_space<vmem>>, vector<1x32xf32>
    %12 = vector.broadcast %11 : vector<1x32xf32> to vector<16x32xf32>
    %13 = arith.addf %10, %12 : vector<16x32xf32>
    %c0_11 = arith.constant 0 : index
    %c0_12 = arith.constant 0 : index
    %14 = vector.load %arg9[%c0_11, %c0_12] : memref<32x32xf32, #tpu.memory_space<vmem>>, vector<32x32xf32>
    %cst_13 = arith.constant dense<0.000000e+00> : vector<16x32xf32>
    %15 = tpu.matmul %3, %14, %cst_13 {dimension_numbers = #tpu.dot_dimension_numbers<[1], [0], [0], [1], [0, 0, 1, 1], [], []>} : vector<16x32xf32>, vector<32x32xf32>, vector<16x32xf32> -> vector<16x32xf32>
    %c0_14 = arith.constant 0 : index
    %c0_15 = arith.constant 0 : index
    %16 = vector.load %arg10[%c0_14, %c0_15] : memref<1x32xf32, #tpu.memory_space<vmem>>, vector<1x32xf32>
    %17 = vector.broadcast %16 : vector<1x32xf32> to vector<16x32xf32>
    %18 = arith.addf %15, %17 : vector<16x32xf32>
    %c0_16 = arith.constant 0 : index
    %c0_17 = arith.constant 0 : index
    %19 = vector.load %arg2[%c0_16, %c0_17] : memref<16x16xf32, #tpu.memory_space<vmem>>, vector<16x16xf32>
    %20 = vector.extract_strided_slice %8 {offsets = [0, 0], sizes = [16, 16], strides = [1, 1]} : vector<16x32xf32> to vector<16x16xf32>
    %21 = vector.extract_strided_slice %13 {offsets = [0, 0], sizes = [16, 16], strides = [1, 1]} : vector<16x32xf32> to vector<16x16xf32>
    %22 = tpu.transpose %21, [1, 0] : vector<16x16xf32> -> vector<16x16xf32>
    %cst_18 = arith.constant dense<0.000000e+00> : vector<16x16xf32>
    %23 = tpu.matmul %20, %22, %cst_18 {dimension_numbers = #tpu.dot_dimension_numbers<[1], [0], [0], [1], [0, 0, 1, 1], [], []>} : vector<16x16xf32>, vector<16x16xf32>, vector<16x16xf32> -> vector<16x16xf32>
    %cst_19 = arith.constant 2.500000e-01 : f32
    %24 = vector.broadcast %cst_19 : f32 to vector<16x16xf32>
    %25 = arith.mulf %23, %24 : vector<16x16xf32>
    %26 = arith.addf %25, %19 : vector<16x16xf32>
    %cst_20 = arith.constant dense<0xFF800000> : vector<16xf32>
    %27 = vector.multi_reduction <maximumf>, %26, %cst_20 [1] : vector<16x16xf32> to vector<16xf32>
    %28 = vector.shape_cast %27 : vector<16xf32> to vector<16x1xf32>
    %29 = vector.broadcast %28 : vector<16x1xf32> to vector<16x16xf32>
    %30 = arith.subf %26, %29 : vector<16x16xf32>
    %31 = math.exp %30 : vector<16x16xf32>
    %cst_21 = arith.constant dense<0.000000e+00> : vector<16xf32>
    %32 = vector.multi_reduction <add>, %31, %cst_21 [1] : vector<16x16xf32> to vector<16xf32>
    %33 = vector.shape_cast %32 : vector<16xf32> to vector<16x1xf32>
    %34 = tpu.reciprocal %33 {approx = true} : vector<16x1xf32> -> vector<16x1xf32>
    %35 = vector.broadcast %34 : vector<16x1xf32> to vector<16x16xf32>
    %36 = arith.mulf %31, %35 : vector<16x16xf32>
    %37 = vector.extract_strided_slice %18 {offsets = [0, 0], sizes = [16, 16], strides = [1, 1]} : vector<16x32xf32> to vector<16x16xf32>
    %cst_22 = arith.constant dense<0.000000e+00> : vector<16x16xf32>
    %38 = tpu.matmul %36, %37, %cst_22 {dimension_numbers = #tpu.dot_dimension_numbers<[1], [0], [0], [1], [0, 0, 1, 1], [], []>} : vector<16x16xf32>, vector<16x16xf32>, vector<16x16xf32> -> vector<16x16xf32>
    %39 = vector.extract_strided_slice %8 {offsets = [0, 16], sizes = [16, 16], strides = [1, 1]} : vector<16x32xf32> to vector<16x16xf32>
    %40 = vector.extract_strided_slice %13 {offsets = [0, 16], sizes = [16, 16], strides = [1, 1]} : vector<16x32xf32> to vector<16x16xf32>
    %41 = tpu.transpose %40, [1, 0] : vector<16x16xf32> -> vector<16x16xf32>
    %cst_23 = arith.constant dense<0.000000e+00> : vector<16x16xf32>
    %42 = tpu.matmul %39, %41, %cst_23 {dimension_numbers = #tpu.dot_dimension_numbers<[1], [0], [0], [1], [0, 0, 1, 1], [], []>} : vector<16x16xf32>, vector<16x16xf32>, vector<16x16xf32> -> vector<16x16xf32>
    %cst_24 = arith.constant 2.500000e-01 : f32
    %43 = vector.broadcast %cst_24 : f32 to vector<16x16xf32>
    %44 = arith.mulf %42, %43 : vector<16x16xf32>
    %45 = arith.addf %44, %19 : vector<16x16xf32>
    %cst_25 = arith.constant dense<0xFF800000> : vector<16xf32>
    %46 = vector.multi_reduction <maximumf>, %45, %cst_25 [1] : vector<16x16xf32> to vector<16xf32>
    %47 = vector.shape_cast %46 : vector<16xf32> to vector<16x1xf32>
    %48 = vector.broadcast %47 : vector<16x1xf32> to vector<16x16xf32>
    %49 = arith.subf %45, %48 : vector<16x16xf32>
    %50 = math.exp %49 : vector<16x16xf32>
    %cst_26 = arith.constant dense<0.000000e+00> : vector<16xf32>
    %51 = vector.multi_reduction <add>, %50, %cst_26 [1] : vector<16x16xf32> to vector<16xf32>
    %52 = vector.shape_cast %51 : vector<16xf32> to vector<16x1xf32>
    %53 = tpu.reciprocal %52 {approx = true} : vector<16x1xf32> -> vector<16x1xf32>
    %54 = vector.broadcast %53 : vector<16x1xf32> to vector<16x16xf32>
    %55 = arith.mulf %50, %54 : vector<16x16xf32>
    %56 = vector.extract_strided_slice %18 {offsets = [0, 16], sizes = [16, 16], strides = [1, 1]} : vector<16x32xf32> to vector<16x16xf32>
    %cst_27 = arith.constant dense<0.000000e+00> : vector<16x16xf32>
    %57 = tpu.matmul %55, %56, %cst_27 {dimension_numbers = #tpu.dot_dimension_numbers<[1], [0], [0], [1], [0, 0, 1, 1], [], []>} : vector<16x16xf32>, vector<16x16xf32>, vector<16x16xf32> -> vector<16x16xf32>
    %58 = tpu.concatenate %38, %57 in 1 : vector<16x16xf32>, vector<16x16xf32> -> vector<16x32xf32>
    %c0_28 = arith.constant 0 : index
    %c0_29 = arith.constant 0 : index
    %59 = vector.load %arg11[%c0_28, %c0_29] : memref<32x32xf32, #tpu.memory_space<vmem>>, vector<32x32xf32>
    %cst_30 = arith.constant dense<0.000000e+00> : vector<16x32xf32>
    %60 = tpu.matmul %58, %59, %cst_30 {dimension_numbers = #tpu.dot_dimension_numbers<[1], [0], [0], [1], [0, 0, 1, 1], [], []>} : vector<16x32xf32>, vector<32x32xf32>, vector<16x32xf32> -> vector<16x32xf32>
    %c0_31 = arith.constant 0 : index
    %c0_32 = arith.constant 0 : index
    %61 = vector.load %arg12[%c0_31, %c0_32] : memref<1x32xf32, #tpu.memory_space<vmem>>, vector<1x32xf32>
    %62 = vector.broadcast %61 : vector<1x32xf32> to vector<16x32xf32>
    %63 = arith.addf %60, %62 : vector<16x32xf32>
    %64 = arith.addf %3, %63 : vector<16x32xf32>
    %c0_33 = arith.constant 0 : index
    %c0_34 = arith.constant 0 : index
    %65 = vector.load %arg13[%c0_33, %c0_34] : memref<1x32xf32, #tpu.memory_space<vmem>>, vector<1x32xf32>
    %c0_35 = arith.constant 0 : index
    %c0_36 = arith.constant 0 : index
    %66 = vector.load %arg14[%c0_35, %c0_36] : memref<1x32xf32, #tpu.memory_space<vmem>>, vector<1x32xf32>
    %cst_37 = arith.constant dense<0.000000e+00> : vector<16xf32>
    %67 = vector.multi_reduction <add>, %64, %cst_37 [1] : vector<16x32xf32> to vector<16xf32>
    %68 = vector.shape_cast %67 : vector<16xf32> to vector<16x1xf32>
    %cst_38 = arith.constant 3.200000e+01 : f32
    %69 = vector.broadcast %cst_38 : f32 to vector<16x1xf32>
    %70 = arith.divf %68, %69 : vector<16x1xf32>
    %71 = vector.broadcast %70 : vector<16x1xf32> to vector<16x32xf32>
    %72 = arith.subf %64, %71 : vector<16x32xf32>
    %73 = arith.mulf %72, %72 : vector<16x32xf32>
    %cst_39 = arith.constant dense<0.000000e+00> : vector<16xf32>
    %74 = vector.multi_reduction <add>, %73, %cst_39 [1] : vector<16x32xf32> to vector<16xf32>
    %75 = vector.shape_cast %74 : vector<16xf32> to vector<16x1xf32>
    %cst_40 = arith.constant 3.200000e+01 : f32
    %76 = vector.broadcast %cst_40 : f32 to vector<16x1xf32>
    %77 = arith.divf %75, %76 : vector<16x1xf32>
    %78 = vector.broadcast %70 : vector<16x1xf32> to vector<16x32xf32>
    %79 = arith.subf %64, %78 : vector<16x32xf32>
    %cst_41 = arith.constant 9.99999996E-13 : f32
    %80 = vector.broadcast %cst_41 : f32 to vector<16x1xf32>
    %81 = arith.addf %77, %80 : vector<16x1xf32>
    %82 = math.rsqrt %81 : vector<16x1xf32>
    %83 = vector.broadcast %82 : vector<16x1xf32> to vector<16x32xf32>
    %84 = arith.mulf %79, %83 : vector<16x32xf32>
    %85 = vector.broadcast %65 : vector<1x32xf32> to vector<16x32xf32>
    %86 = arith.mulf %84, %85 : vector<16x32xf32>
    %87 = vector.broadcast %66 : vector<1x32xf32> to vector<16x32xf32>
    %88 = arith.addf %86, %87 : vector<16x32xf32>
    %c0_42 = arith.constant 0 : index
    %c0_43 = arith.constant 0 : index
    %89 = vector.load %arg15[%c0_42, %c0_43] : memref<32x64xf32, #tpu.memory_space<vmem>>, vector<32x64xf32>
    %cst_44 = arith.constant dense<0.000000e+00> : vector<16x64xf32>
    %90 = tpu.matmul %88, %89, %cst_44 {dimension_numbers = #tpu.dot_dimension_numbers<[1], [0], [0], [1], [0, 0, 1, 1], [], []>} : vector<16x32xf32>, vector<32x64xf32>, vector<16x64xf32> -> vector<16x64xf32>
    %c0_45 = arith.constant 0 : index
    %c0_46 = arith.constant 0 : index
    %91 = vector.load %arg16[%c0_45, %c0_46] : memref<1x64xf32, #tpu.memory_space<vmem>>, vector<1x64xf32>
    %92 = vector.broadcast %91 : vector<1x64xf32> to vector<16x64xf32>
    %93 = arith.addf %90, %92 : vector<16x64xf32>
    %94 = arith.mulf %93, %93 : vector<16x64xf32>
    %95 = arith.mulf %93, %94 : vector<16x64xf32>
    %cst_47 = arith.constant 4.471500e-02 : f32
    %96 = vector.broadcast %cst_47 : f32 to vector<16x64xf32>
    %97 = arith.mulf %96, %95 : vector<16x64xf32>
    %98 = arith.addf %93, %97 : vector<16x64xf32>
    %cst_48 = arith.constant 0.797884583 : f32
    %99 = vector.broadcast %cst_48 : f32 to vector<16x64xf32>
    %100 = arith.mulf %99, %98 : vector<16x64xf32>
    %101 = math.tanh %100 : vector<16x64xf32>
    %cst_49 = arith.constant 1.000000e+00 : f32
    %102 = vector.broadcast %cst_49 : f32 to vector<16x64xf32>
    %103 = arith.addf %102, %101 : vector<16x64xf32>
    %cst_50 = arith.constant 5.000000e-01 : f32
    %104 = vector.broadcast %cst_50 : f32 to vector<16x64xf32>
    %105 = arith.mulf %104, %103 : vector<16x64xf32>
    %106 = arith.mulf %93, %105 : vector<16x64xf32>
    %c0_51 = arith.constant 0 : index
    %c0_52 = arith.constant 0 : index
    %107 = vector.load %arg17[%c0_51, %c0_52] : memref<64x32xf32, #tpu.memory_space<vmem>>, vector<64x32xf32>
    %cst_53 = arith.constant dense<0.000000e+00> : vector<16x32xf32>
    %108 = tpu.matmul %106, %107, %cst_53 {dimension_numbers = #tpu.dot_dimension_numbers<[1], [0], [0], [1], [0, 0, 1, 1], [], []>} : vector<16x64xf32>, vector<64x32xf32>, vector<16x32xf32> -> vector<16x32xf32>
    %c0_54 = arith.constant 0 : index
    %c0_55 = arith.constant 0 : index
    %109 = vector.load %arg18[%c0_54, %c0_55] : memref<1x32xf32, #tpu.memory_space<vmem>>, vector<1x32xf32>
    %110 = vector.broadcast %109 : vector<1x32xf32> to vector<16x32xf32>
    %111 = arith.addf %108, %110 : vector<16x32xf32>
    %112 = arith.addf %88, %111 : vector<16x32xf32>
    %c0_56 = arith.constant 0 : index
    %c0_57 = arith.constant 0 : index
    %113 = vector.load %arg19[%c0_56, %c0_57] : memref<1x32xf32, #tpu.memory_space<vmem>>, vector<1x32xf32>
    %c0_58 = arith.constant 0 : index
    %c0_59 = arith.constant 0 : index
    %114 = vector.load %arg20[%c0_58, %c0_59] : memref<1x32xf32, #tpu.memory_space<vmem>>, vector<1x32xf32>
    %cst_60 = arith.constant dense<0.000000e+00> : vector<16xf32>
    %115 = vector.multi_reduction <add>, %112, %cst_60 [1] : vector<16x32xf32> to vector<16xf32>
    %116 = vector.shape_cast %115 : vector<16xf32> to vector<16x1xf32>
    %cst_61 = arith.constant 3.200000e+01 : f32
    %117 = vector.broadcast %cst_61 : f32 to vector<16x1xf32>
    %118 = arith.divf %116, %117 : vector<16x1xf32>
    %119 = vector.broadcast %118 : vector<16x1xf32> to vector<16x32xf32>
    %120 = arith.subf %112, %119 : vector<16x32xf32>
    %121 = arith.mulf %120, %120 : vector<16x32xf32>
    %cst_62 = arith.constant dense<0.000000e+00> : vector<16xf32>
    %122 = vector.multi_reduction <add>, %121, %cst_62 [1] : vector<16x32xf32> to vector<16xf32>
    %123 = vector.shape_cast %122 : vector<16xf32> to vector<16x1xf32>
    %cst_63 = arith.constant 3.200000e+01 : f32
    %124 = vector.broadcast %cst_63 : f32 to vector<16x1xf32>
    %125 = arith.divf %123, %124 : vector<16x1xf32>
    %126 = vector.broadcast %118 : vector<16x1xf32> to vector<16x32xf32>
    %127 = arith.subf %112, %126 : vector<16x32xf32>
    %cst_64 = arith.constant 9.99999996E-13 : f32
    %128 = vector.broadcast %cst_64 : f32 to vector<16x1xf32>
    %129 = arith.addf %125, %128 : vector<16x1xf32>
    %130 = math.rsqrt %129 : vector<16x1xf32>
    %131 = vector.broadcast %130 : vector<16x1xf32> to vector<16x32xf32>
    %132 = arith.mulf %127, %131 : vector<16x32xf32>
    %133 = vector.broadcast %113 : vector<1x32xf32> to vector<16x32xf32>
    %134 = arith.mulf %132, %133 : vector<16x32xf32>
    %135 = vector.broadcast %114 : vector<1x32xf32> to vector<16x32xf32>
    %136 = arith.addf %134, %135 : vector<16x32xf32>
    %c0_65 = arith.constant 0 : index
    %c0_66 = arith.constant 0 : index
    %137 = vector.load %arg27[%c0_65, %c0_66] : memref<16x32xf32, #tpu.memory_space<vmem>>, vector<16x32xf32>
    tpu.vector_store %arg27[%c0_65, %c0_66], %136 {strides = array<i32>} : memref<16x32xf32, #tpu.memory_space<vmem>>, vector<16x32xf32>,
    %c0_67 = arith.constant 0 : index
    %c0_68 = arith.constant 0 : index
    %138 = vector.load %arg3[%c0_67, %c0_68] : memref<8x16xf32, #tpu.memory_space<vmem>>, vector<8x16xf32>
    %cst_69 = arith.constant dense<0.000000e+00> : vector<8x32xf32>
    %139 = tpu.matmul %138, %136, %cst_69 {dimension_numbers = #tpu.dot_dimension_numbers<[1], [0], [0], [1], [0, 0, 1, 1], [], []>} : vector<8x16xf32>, vector<16x32xf32>, vector<8x32xf32> -> vector<8x32xf32>
    %c8_i32 = arith.constant 8 : i32
    %140 = arith.muli %arg0, %c8_i32 : i32
    %141 = tpu.assume_multiple %140, 8 : i32
    %142 = arith.index_cast %141 : i32 to index
    %c0_70 = arith.constant 0 : index
    %143 = vector.load %arg28[%142, %c0_70] : memref<96x32xf32, #tpu.memory_space<vmem>>, vector<8x32xf32>
    tpu.vector_store %arg28[%142, %c0_70], %139 {strides = array<i32>} : memref<96x32xf32, #tpu.memory_space<vmem>>, vector<8x32xf32>,
    %c11_i32 = arith.constant 11 : i32
    %144 = arith.cmpi eq, %arg0, %c11_i32 : i32
    %145 = arith.extui %144 : i1 to i32
    %c0_i32_71 = arith.constant 0 : i32
    %146 = arith.cmpi ne, %145, %c0_i32_71 : i32
    scf.if %146 {
      %c0_72 = arith.constant 0 : index
      %c0_73 = arith.constant 0 : index
      %147 = vector.load %arg28[%c0_72, %c0_73] : memref<96x32xf32, #tpu.memory_space<vmem>>, vector<96x32xf32>
      %c0_74 = arith.constant 0 : index
      %c0_75 = arith.constant 0 : index
      %148 = vector.load %arg4[%c0_74, %c0_75] : memref<8x1xf32, #tpu.memory_space<vmem>>, vector<8x1xf32>
      %c0_76 = arith.constant 0 : index
      %c0_77 = arith.constant 0 : index
      %149 = vector.load %arg21[%c0_76, %c0_77] : memref<32x32xf32, #tpu.memory_space<vmem>>, vector<32x32xf32>
      %cst_78 = arith.constant dense<0.000000e+00> : vector<96x32xf32>
      %150 = tpu.matmul %147, %149, %cst_78 {dimension_numbers = #tpu.dot_dimension_numbers<[1], [0], [0], [1], [0, 0, 1, 1], [], []>} : vector<96x32xf32>, vector<32x32xf32>, vector<96x32xf32> -> vector<96x32xf32>
      %c0_79 = arith.constant 0 : index
      %c0_80 = arith.constant 0 : index
      %151 = vector.load %arg22[%c0_79, %c0_80] : memref<1x32xf32, #tpu.memory_space<vmem>>, vector<1x32xf32>
      %152 = vector.broadcast %151 : vector<1x32xf32> to vector<96x32xf32>
      %153 = arith.addf %150, %152 : vector<96x32xf32>
      %154 = math.tanh %153 : vector<96x32xf32>
      %c0_81 = arith.constant 0 : index
      %c0_82 = arith.constant 0 : index
      %155 = vector.load %arg23[%c0_81, %c0_82] : memref<32x1xf32, #tpu.memory_space<vmem>>, vector<32x1xf32>
      %cst_83 = arith.constant dense<0.000000e+00> : vector<96x1xf32>
      %156 = tpu.matmul %154, %155, %cst_83 {dimension_numbers = #tpu.dot_dimension_numbers<[1], [0], [0], [1], [0, 0, 1, 1], [], []>} : vector<96x32xf32>, vector<32x1xf32>, vector<96x1xf32> -> vector<96x1xf32>
      %157 = vector.shape_cast %156 : vector<96x1xf32> to vector<12x8x1xf32>
      %cst_84 = arith.constant dense<0xFF800000> : vector<8x1xf32>
      %158 = vector.multi_reduction <maximumf>, %157, %cst_84 [0] : vector<12x8x1xf32> to vector<8x1xf32>
      %159 = vector.shape_cast %158 : vector<8x1xf32> to vector<1x8x1xf32>
      %160 = vector.broadcast %159 : vector<1x8x1xf32> to vector<12x8x1xf32>
      %161 = arith.subf %157, %160 : vector<12x8x1xf32>
      %162 = math.exp %161 : vector<12x8x1xf32>
      %cst_85 = arith.constant dense<0.000000e+00> : vector<8x1xf32>
      %163 = vector.multi_reduction <add>, %162, %cst_85 [0] : vector<12x8x1xf32> to vector<8x1xf32>
      %164 = vector.shape_cast %163 : vector<8x1xf32> to vector<1x8x1xf32>
      %165 = tpu.reciprocal %164 {approx = true} : vector<1x8x1xf32> -> vector<1x8x1xf32>
      %166 = vector.broadcast %165 : vector<1x8x1xf32> to vector<12x8x1xf32>
      %167 = arith.mulf %162, %166 : vector<12x8x1xf32>
      %168 = vector.shape_cast %147 : vector<96x32xf32> to vector<12x8x32xf32>
      %169 = vector.broadcast %167 : vector<12x8x1xf32> to vector<12x8x32xf32>
      %170 = arith.mulf %169, %168 : vector<12x8x32xf32>
      %cst_86 = arith.constant dense<0.000000e+00> : vector<8x32xf32>
      %171 = vector.multi_reduction <add>, %170, %cst_86 [0] : vector<12x8x32xf32> to vector<8x32xf32>
      %172 = vector.extract_strided_slice %168 {offsets = [11, 0, 0], sizes = [1, 8, 32], strides = [1, 1, 1]} : vector<12x8x32xf32> to vector<1x8x32xf32>
      %173 = vector.shape_cast %172 : vector<1x8x32xf32> to vector<8x32xf32>
      %174 = tpu.concatenate %171, %173 in 1 : vector<8x32xf32>, vector<8x32xf32> -> vector<8x64xf32>
      %175 = vector.broadcast %148 : vector<8x1xf32> to vector<8x64xf32>
      %176 = arith.mulf %174, %175 : vector<8x64xf32>
      %c0_87 = arith.constant 0 : index
      %c0_88 = arith.constant 0 : index
      %177 = vector.load %arg24[%c0_87, %c0_88] : memref<64x1xf32, #tpu.memory_space<vmem>>, vector<64x1xf32>
      %cst_89 = arith.constant dense<0.000000e+00> : vector<8x1xf32>
      %178 = tpu.matmul %176, %177, %cst_89 {dimension_numbers = #tpu.dot_dimension_numbers<[1], [0], [0], [1], [0, 0, 1, 1], [], []>} : vector<8x64xf32>, vector<64x1xf32>, vector<8x1xf32> -> vector<8x1xf32>
      %c0_90 = arith.constant 0 : index
      %c0_91 = arith.constant 0 : index
      %179 = vector.load %arg25[%c0_90, %c0_91] : memref<1x1xf32, #tpu.memory_space<vmem>>, vector<1x1xf32>
      %180 = vector.broadcast %179 : vector<1x1xf32> to vector<8x1xf32>
      %181 = arith.addf %178, %180 : vector<8x1xf32>
      %182 = arith.negf %181 : vector<8x1xf32>
      %183 = math.exp %182 : vector<8x1xf32>
      %cst_92 = arith.constant 1.000000e+00 : f32
      %184 = vector.broadcast %cst_92 : f32 to vector<8x1xf32>
      %185 = arith.addf %184, %183 : vector<8x1xf32>
      %186 = arith.divf %184, %185 : vector<8x1xf32>
      %187 = arith.mulf %186, %148 : vector<8x1xf32>
      %c0_93 = arith.constant 0 : index
      %c0_94 = arith.constant 0 : index
      %188 = vector.load %arg26[%c0_93, %c0_94] : memref<8x1xf32, #tpu.memory_space<vmem>>, vector<8x1xf32>
      tpu.vector_store %arg26[%c0_93, %c0_94], %187 {strides = array<i32>} : memref<8x1xf32, #tpu.memory_space<vmem>>, vector<8x1xf32>,
    } else {
    }
    return
  }
  func.func @transform_0(%arg0: i32) -> (i32, i32) {
    %c0_i32 = arith.constant 0 : i32
    %c0_i32_0 = arith.constant 0 : i32
    %c0_i32_1 = arith.constant 0 : i32
    return %c0_i32, %c0_i32_0 : i32, i32
  }
  func.func @transform_1(%arg0: i32) -> (i32, i32) {
    %c0_i32 = arith.constant 0 : i32
    %c0_i32_0 = arith.constant 0 : i32
    %c0_i32_1 = arith.constant 0 : i32
    return %c0_i32, %c0_i32_0 : i32, i32
  }
  func.func @transform_2(%arg0: i32) -> (i32, i32) {
    %c0_i32 = arith.constant 0 : i32
    %c0_i32_0 = arith.constant 0 : i32
    %c0_i32_1 = arith.constant 0 : i32
    return %c0_i32, %c0_i32_0 : i32, i32
  }
  func.func @transform_3(%arg0: i32) -> (i32, i32) {
    %c0_i32 = arith.constant 0 : i32
    %c0_i32_0 = arith.constant 0 : i32
    %c0_i32_1 = arith.constant 0 : i32
    return %c0_i32, %c0_i32_0 : i32, i32
  }
  func.func @transform_4(%arg0: i32) -> (i32, i32) {
    %c0_i32 = arith.constant 0 : i32
    %c0_i32_0 = arith.constant 0 : i32
    %c0_i32_1 = arith.constant 0 : i32
    return %c0_i32, %c0_i32_0 : i32, i32
  }
  func.func @transform_5(%arg0: i32) -> (i32, i32) {
    %c0_i32 = arith.constant 0 : i32
    %c0_i32_0 = arith.constant 0 : i32
    %c0_i32_1 = arith.constant 0 : i32
    return %c0_i32, %c0_i32_0 : i32, i32
  }
  func.func @transform_6(%arg0: i32) -> (i32, i32) {
    %c0_i32 = arith.constant 0 : i32
    %c0_i32_0 = arith.constant 0 : i32
    %c0_i32_1 = arith.constant 0 : i32
    return %c0_i32, %c0_i32_0 : i32, i32
  }
  func.func @transform_7(%arg0: i32) -> (i32, i32) {
    %c0_i32 = arith.constant 0 : i32
    %c0_i32_0 = arith.constant 0 : i32
    %c0_i32_1 = arith.constant 0 : i32
    return %c0_i32, %c0_i32_0 : i32, i32
  }
  func.func @transform_8(%arg0: i32) -> (i32, i32) {
    %c0_i32 = arith.constant 0 : i32
    %c0_i32_0 = arith.constant 0 : i32
    %c0_i32_1 = arith.constant 0 : i32
    return %c0_i32, %c0_i32_0 : i32, i32
  }
  func.func @transform_9(%arg0: i32) -> (i32, i32) {
    %c0_i32 = arith.constant 0 : i32
    %c0_i32_0 = arith.constant 0 : i32
    %c0_i32_1 = arith.constant 0 : i32
    return %c0_i32, %c0_i32_0 : i32, i32
  }
  func.func @transform_10(%arg0: i32) -> (i32, i32) {
    %c0_i32 = arith.constant 0 : i32
    %c0_i32_0 = arith.constant 0 : i32
    %c0_i32_1 = arith.constant 0 : i32
    return %c0_i32, %c0_i32_0 : i32, i32
  }
  func.func @transform_11(%arg0: i32) -> (i32, i32) {
    %c0_i32 = arith.constant 0 : i32
    %c0_i32_0 = arith.constant 0 : i32
    %c0_i32_1 = arith.constant 0 : i32
    return %c0_i32, %c0_i32_0 : i32, i32
  }
  func.func @transform_12(%arg0: i32) -> (i32, i32) {
    %c0_i32 = arith.constant 0 : i32
    %c0_i32_0 = arith.constant 0 : i32
    %c0_i32_1 = arith.constant 0 : i32
    return %c0_i32, %c0_i32_0 : i32, i32
  }
  func.func @transform_13(%arg0: i32) -> (i32, i32) {
    %c0_i32 = arith.constant 0 : i32
    %c0_i32_0 = arith.constant 0 : i32
    %c0_i32_1 = arith.constant 0 : i32
    return %c0_i32, %c0_i32_0 : i32, i32
  }
  func.func @transform_14(%arg0: i32) -> (i32, i32) {
    %c0_i32 = arith.constant 0 : i32
    %c0_i32_0 = arith.constant 0 : i32
    %c0_i32_1 = arith.constant 0 : i32
    return %c0_i32, %c0_i32_0 : i32, i32
  }
  func.func @transform_15(%arg0: i32) -> (i32, i32) {
    %c0_i32 = arith.constant 0 : i32
    %c0_i32_0 = arith.constant 0 : i32
    %c0_i32_1 = arith.constant 0 : i32
    return %c0_i32, %c0_i32_0 : i32, i32
  }
  func.func @transform_16(%arg0: i32) -> (i32, i32) {
    %c0_i32 = arith.constant 0 : i32
    %c0_i32_0 = arith.constant 0 : i32
    %c0_i32_1 = arith.constant 0 : i32
    return %c0_i32, %c0_i32_0 : i32, i32
  }
  func.func @transform_17(%arg0: i32) -> (i32, i32) {
    %c0_i32 = arith.constant 0 : i32
    %c0_i32_0 = arith.constant 0 : i32
    %c0_i32_1 = arith.constant 0 : i32
    return %c0_i32, %c0_i32_0 : i32, i32
  }
  func.func @transform_18(%arg0: i32) -> (i32, i32) {
    %c0_i32 = arith.constant 0 : i32
    %c0_i32_0 = arith.constant 0 : i32
    %c0_i32_1 = arith.constant 0 : i32
    return %c0_i32, %c0_i32_0 : i32, i32
  }
  func.func @transform_19(%arg0: i32) -> (i32, i32) {
    %c0_i32 = arith.constant 0 : i32
    %c0_i32_0 = arith.constant 0 : i32
    %c0_i32_1 = arith.constant 0 : i32
    return %c0_i32, %c0_i32_0 : i32, i32
  }
  func.func @transform_20(%arg0: i32) -> (i32, i32) {
    %c0_i32 = arith.constant 0 : i32
    %c0_i32_0 = arith.constant 0 : i32
    %c0_i32_1 = arith.constant 0 : i32
    return %c0_i32, %c0_i32_0 : i32, i32
  }
  func.func @transform_21(%arg0: i32) -> (i32, i32) {
    %c0_i32 = arith.constant 0 : i32
    %c0_i32_0 = arith.constant 0 : i32
    %c0_i32_1 = arith.constant 0 : i32
    return %c0_i32, %c0_i32_0 : i32, i32
  }
  func.func @transform_22(%arg0: i32) -> (i32, i32) {
    %c0_i32 = arith.constant 0 : i32
    %c0_i32_0 = arith.constant 0 : i32
    %c0_i32_1 = arith.constant 0 : i32
    return %c0_i32, %c0_i32_0 : i32, i32
  }
  func.func @transform_23(%arg0: i32) -> (i32, i32) {
    %c0_i32 = arith.constant 0 : i32
    %c0_i32_0 = arith.constant 0 : i32
    %c0_i32_1 = arith.constant 0 : i32
    return %c0_i32, %c0_i32_0 : i32, i32
  }
  func.func @transform_24(%arg0: i32) -> (i32, i32) {
    %c0_i32 = arith.constant 0 : i32
    %c0_i32_0 = arith.constant 0 : i32
    %c0_i32_1 = arith.constant 0 : i32
    return %c0_i32, %c0_i32_0 : i32, i32
  }
  func.func @transform_25(%arg0: i32) -> (i32, i32) {
    %c0_i32 = arith.constant 0 : i32
    %c0_i32_0 = arith.constant 0 : i32
    %c0_i32_1 = arith.constant 0 : i32
    return %c0_i32, %c0_i32_0 : i32, i32
  }
}

</mosaic_0001>

<bundles_post_ra>
// kernel: tpu_custom_call.1
= control target key start
LH: loop header
LB: loop body
LE: loop exit
PB: predicated region body
PF: predicated region fallthrough
CT: control target
= control target key end

     0   :  { %s4074_s0 = inlined_call_operand.hbm [shape: f32[16,32], index: 0, kind: input, shape index: {}]   ;;  %s4075_s1 = inlined_call_operand.hbm [shape: f32[16,16], index: 1, kind: input, shape index: {}]   ;;  %s4076_s2 = inlined_call_operand.hbm [shape: f32[8,16], index: 2, kind: input, shape index: {}]   ;;  %s4077_s3 = inlined_call_operand.vmem [shape: f32[8,1], index: 3, kind: input, shape index: {}]   ;;  %s4078_s4 = inlined_call_operand.vmem [shape: f32[32,32], index: 4, kind: input, shape index: {}]   ;;  %s4079_s5 = inlined_call_operand.hbm [shape: f32[1,32], index: 5, kind: input, shape index: {}]   ;;  %s4080_s6 = inlined_call_operand.vmem [shape: f32[32,32], index: 6, kind: input, shape index: {}]   ;;  %s4081_s7 = inlined_call_operand.vmem [shape: f32[1,32], index: 7, kind: input, shape index: {}]   ;;  %s4082_s8 = inlined_call_operand.vmem [shape: f32[32,32], index: 8, kind: input, shape index: {}]   ;;  %s4083_s9 = inlined_call_operand.vmem [shape: f32[1,32], index: 9, kind: input, shape index: {}]   ;;  %s4084_s10 = inlined_call_operand.vmem [shape: f32[32,32], index: 10, kind: input, shape index: {}]   ;;  %s4085_s11 = inlined_call_operand.vmem [shape: f32[1,32], index: 11, kind: input, shape index: {}]   ;;  %s4086_s12 = inlined_call_operand.vmem [shape: f32[1,32], index: 12, kind: input, shape index: {}]   ;;  %s4087_s13 = inlined_call_operand.vmem [shape: f32[1,32], index: 13, kind: input, shape index: {}]   ;;  %s4088_s14 = inlined_call_operand.vmem [shape: f32[32,64], index: 14, kind: input, shape index: {}]   ;;  %s4089_s15 = inlined_call_operand.vmem [shape: f32[1,64], index: 15, kind: input, shape index: {}]   ;;  %s4090_s16 = inlined_call_operand.vmem [shape: f32[64,32], index: 16, kind: input, shape index: {}]   ;;  %s4091_s17 = inlined_call_operand.vmem [shape: f32[1,32], index: 17, kind: input, shape index: {}]   ;;  %s4092_s18 = inlined_call_operand.vmem [shape: f32[1,32], index: 18, kind: input, shape index: {}]   ;;  %s4093_s19 = inlined_call_operand.vmem [shape: f32[1,32], index: 19, kind: input, shape index: {}]   ;;  %s4094_s20 = inlined_call_operand.vmem [shape: f32[32,32], index: 20, kind: input, shape index: {}]   ;;  %s4095_s21 = inlined_call_operand.vmem [shape: f32[1,32], index: 21, kind: input, shape index: {}]   ;;  %s4096_s22 = inlined_call_operand.vmem [shape: f32[32,1], index: 22, kind: input, shape index: {}]   ;;  %s4097_s23 = inlined_call_operand.vmem [shape: f32[64,1], index: 23, kind: input, shape index: {}]   ;;  %s4098_s24 = inlined_call_operand.<no memory space> [shape: f32[1,1], index: 24, kind: input, shape index: {}]   ;;  %s4099_s25 = inlined_call_operand.vmem [shape: f32[8,1], index: 25, kind: output, shape index: {}]  }
   0x1   :  { %4113 = sst [smem:[#allocation16_spill]] %s4074_s0  ;;  %v30_v0 = vstv %s4098_s24 }
   0x2   :  { %4114 = sst [smem:[#allocation17_spill]] %s4075_s1  ;;  %31 = vst [vmem:[#allocation4] sm:$0x1] %v30_v0 }
   0x3   :  { %4115 = sst [smem:[#allocation18_spill]] %s4076_s2 }
   0x4   :  { %4116 = sst [smem:[#allocation19_spill]] %s4077_s3 }
   0x5   :  { %4117 = sst [smem:[#allocation20_spill]] %s4078_s4 }
   0x6   :  { %4118 = sst [smem:[#allocation21_spill]] %s4079_s5 }
   0x7   :  { %4119 = sst [smem:[#allocation22_spill]] %s4080_s6 }
   0x8   :  { %4120 = sst [smem:[#allocation23_spill]] %s4081_s7 }
   0x9   :  { %4121 = sst [smem:[#allocation24_spill]] %s4082_s8 }
   0xa   :  { %4122 = sst [smem:[#allocation25_spill]] %s4083_s9 }
   0xb   :  { %4123 = sst [smem:[#allocation26_spill]] %s4094_s20 }
   0xc   :  { %4124 = sst [smem:[#allocation27_spill]] %s4095_s21 }
   0xd   :  { %4125 = sst [smem:[#allocation28_spill]] %s4096_s22 }
   0xe   :  { %4126 = sst [smem:[#allocation29_spill]] %s4097_s23 }
   0xf   :  { %4127 = sst [smem:[#allocation30_spill]] %s4099_s25 }
  0x10   :  { %32 = vsyncpa [#allocation6], 0 }
  0x11   :  { %33 = vsyncpa [#allocation8], 0 }
  0x12   :  { %34 = vsyncpa [#allocation11], 0  ;;  %s3571_s6 = smov 0  }
  0x13 LB: > { %4128 = sst [smem:[#allocation15_spill]] %s3420_s6  ;;  %s3577_s30 = sadd.s32 4294967295, %s3420_s6   ;;  %s3420_s6 = sphi %s3571_s6, %s40_s6  }
  0x14   : > { %p2670_p0 = scmp.ge.s32.totalorder %s3420_s6, 1  ;;  %p591_p1 = scmp.lt.s32.totalorder %s3420_s6, 13 }
  0x15   : > { %p4111_p3 = scmp.eq.s32.totalorder %s3577_s30, 0  ;;  %s3422_s7 = smov [#allocation7]  }
  0x16   : > { %p3583_p4 = pnand %p2670_p0, %p591_p1  ;;  %s616_s3 = sshll.u32 %s3422_s7, 4  ;;  %s3587_s3 = int_to_ptr.vmem [resolvable:$true] %s616_s3 }
  0x17   : > { %s3423_s26 = smov [#allocation5]   ;;  %s3424_s27 = smov [#allocation9]  }
  0x18   : > { %s4129_s24 = scalar_select %p3583_p4, 1, 0 }
  0x19   : > { %p3151_p5 = pneg %p3583_p4  ;;  %s603_s1 = sshll.u32 %s3423_s26, 4  ;;  %s3591_s1 = int_to_ptr.vmem [resolvable:$true] %s603_s1 }
  0x1a   : > { %s630_s4 = sshll.u32 %s3424_s27, 4  ;;  %s3425_s28 = smov [#allocation10]   ;;  %s3599_s4 = int_to_ptr.vmem [resolvable:$true] %s630_s4 }
  0x1b   : > { %p3595_p6 = pnand %p4111_p3, %p3151_p5  ;;  %s3601_s9 = sshll.u32 %s3425_s28, 4  ;;  %s648_s9 = int_to_ptr.vmem [resolvable:$true] %s3601_s9 }
  0x1c   : > { %s4131_s29 = sld [smem:[#allocation17_spill]] }
  0x1d   : > { %p3611_p8 = pneg %p3595_p6 }
  0x22   : > { %s3290_s2 = scalar_lea.hbm %s4131_s29, 256 }
  0x23   : > { %p3291_p7 = scmp.ne.s32.totalorder %s4131_s29, %s3290_s2  ;;  %p3297_p11 = scmp.lt.u32.totalorder %s3290_s2, %s4131_s29 }
  0x25   : > { %p3293_p9 = pnand %p3611_p8, %p3291_p7 }
  0x27   : > { %p3294_p10 = pneg %p3293_p9 }
  0x29   : > { %p3299_p12 = pnand %p3297_p11, %p3294_p10 }
  0x2b   : > { %3302 = shalt.err (!%p3299_p12)
}
  0x2c   : > { %s3303_s5 = scalar_lea.vmem %s3587_s3, 256  ;;  %p3311_p5 = scmp.lt.s32.totalorder %s3587_s3, %s3587_s3 }
  0x2d   : > { %p3304_p13 = scmp.ne.s32.totalorder %s3587_s3, %s3303_s5  ;;  %p3312_p2 = scmp.lt.s32.totalorder %s3303_s5, %s3303_s5 }
  0x2f   : > { %p3306_p0 = pnand %p3304_p13, %p3611_p8  ;;  %p3313_p7 = por %p3312_p2, %p3311_p5 }
  0x31   : > { %p3307_p1 = pneg %p3306_p0 }
  0x33   : > { %p3314_p9 = pnand %p3313_p7, %p3307_p1 }
  0x35   : > { %3317 = shalt.err (!%p3314_p9)
}
  0x36   : > { %s3426_s0 = smov 128   ;;  %s3427_s2 = smov 8  }
  0x37   : > { %3157 = dma.hbm_to_vmem [thread:$0]  (!%p3595_p6), %s4131_s29, 256, %s3587_s3, [#allocation8], %s3426_s0, %s3426_s0, %s3427_s2  }
  0x38   : > { %s4133_s25 = sld [smem:[#allocation16_spill]] }
  0x3e   : > { %s3318_s23 = scalar_lea.hbm %s4133_s25, 256 }
  0x3f   : > { %p3319_p2 = scmp.ne.s32.totalorder %s4133_s25, %s3318_s23  ;;  %p3325_p12 = scmp.lt.u32.totalorder %s3318_s23, %s4133_s25 }
  0x41   : > { %p3321_p10 = pnand %p3319_p2, %p3611_p8 }
  0x43   : > { %p3322_p11 = pneg %p3321_p10 }
  0x45   : > { %p3327_p13 = pnand %p3325_p12, %p3322_p11 }
  0x47   : > { %3330 = shalt.err (!%p3327_p13)
}
  0x48   : > { %s3331_s3 = scalar_lea.vmem %s3591_s1, 256  ;;  %p3339_p7 = scmp.lt.s32.totalorder %s3591_s1, %s3591_s1 }
  0x49   : > { %p3332_p0 = scmp.ne.s32.totalorder %s3591_s1, %s3331_s3  ;;  %p3340_p9 = scmp.lt.s32.totalorder %s3331_s3, %s3331_s3 }
  0x4b   : > { %p3334_p1 = pnand %p3332_p0, %p3611_p8  ;;  %p3341_p2 = por %p3340_p9, %p3339_p7 }
  0x4d   : > { %p3335_p5 = pneg %p3334_p1 }
  0x4f   : > { %p3342_p10 = pnand %p3341_p2, %p3335_p5 }
  0x51   : > { %3345 = shalt.err (!%p3342_p10)
}
  0x52   : > { %3154 = dma.hbm_to_vmem [thread:$0]  (!%p3595_p6), %s4133_s25, 256, %s3591_s1, [#allocation6], %s3426_s0, %s3426_s0, %s3427_s2  }
  0x53   : > { %s4134_s7 = sld [smem:[#allocation18_spill]] }
  0x59   : > { %s3346_s26 = scalar_lea.hbm %s4134_s7, 128 }
  0x5a   : > { %p3347_p11 = scmp.ne.s32.totalorder %s4134_s7, %s3346_s26  ;;  %p3353_p0 = scmp.lt.u32.totalorder %s3346_s26, %s4134_s7 }
  0x5c   : > { %p3349_p12 = pnand %p3347_p11, %p3611_p8 }
  0x5e   : > { %p3350_p13 = pneg %p3349_p12 }
  0x60   : > { %p3355_p1 = pnand %p3353_p0, %p3350_p13 }
  0x62   : > { %3358 = shalt.err (!%p3355_p1)
}
  0x63   : > { %s3359_s1 = scalar_lea.vmem %s3599_s4, 128  ;;  %p3367_p2 = scmp.lt.s32.totalorder %s3599_s4, %s3599_s4 }
  0x64   : > { %p3360_p5 = scmp.ne.s32.totalorder %s3599_s4, %s3359_s1  ;;  %p3368_p10 = scmp.lt.s32.totalorder %s3359_s1, %s3359_s1 }
  0x66   : > { %p3362_p7 = pnand %p3360_p5, %p3611_p8  ;;  %p3369_p11 = por %p3368_p10, %p3367_p2 }
  0x68   : > { %p3363_p9 = pneg %p3362_p7 }
  0x6a   : > { %p3370_p12 = pnand %p3369_p11, %p3363_p9 }
  0x6c   : > { %3373 = shalt.err (!%p3370_p12)
}
  0x6d   : > { %3160 = dma.hbm_to_vmem [thread:$0]  (!%p3595_p6), %s4134_s7, 128, %s3599_s4, [#allocation8]  }
  0x6e   : > { %s4135_s22 = sld [smem:[#allocation21_spill]] }
  0x74   : > { %s3374_s23 = scalar_lea.hbm %s4135_s22, 16 }
  0x75   : > { %p3375_p13 = scmp.ne.s32.totalorder %s4135_s22, %s3374_s23  ;;  %p3381_p5 = scmp.lt.u32.totalorder %s3374_s23, %s4135_s22 }
  0x77   : > { %p3377_p0 = pnand %p3375_p13, %p3611_p8 }
  0x79   : > { %p3378_p1 = pneg %p3377_p0 }
  0x7b   : > { %p3383_p7 = pnand %p3381_p5, %p3378_p1 }
  0x7d   : > { %3386 = shalt.err (!%p3383_p7)
}
  0x7e   : > { %s3387_s3 = scalar_lea.vmem %s648_s9, 16  ;;  %s3394_s4 = scalar_lea.vmem %s648_s9, 32 }
  0x7f   : > { %p3388_p9 = scmp.ne.s32.totalorder %s648_s9, %s3387_s3  ;;  %p3395_p11 = scmp.lt.s32.totalorder %s648_s9, %s648_s9 }
  0x80   : > { %p3396_p12 = scmp.lt.s32.totalorder %s3394_s4, %s3387_s3 }
  0x81   : > { %p3390_p2 = pnand %p3388_p9, %p3611_p8 }
  0x82   : > { %p3397_p3 = por %p3396_p12, %p3395_p11 }
  0x83   : > { %p3391_p10 = pneg %p3390_p2 }
  0x85   : > { %p3398_p4 = pnand %p3397_p3, %p3391_p10 }
  0x87   : > { %3401 = shalt.err (!%p3398_p4)
}
  0x88   : > { %3163 = dma.hbm_to_vmem [thread:$0]  (!%p3595_p6), %s4135_s22, 16, %s648_s9, [#allocation11]  }
  0x89   : > { %p4136_p13 = scmp.ne.s32.totalorder %s4129_s24, 0 }
  0x8a   : > { %p4137_p0 = scmp.eq.s32.totalorder (!%p4136_p13), %s3577_s30, 0 }
  0x8b   : > { %717 = sbr.rel (%p4136_p13) target bundleno = 3852 (0xf0c), region = 120 }
  0x92   : > { %3407 = dma.done.wait (%p4137_p0), [#allocation6], 256   ;;  %p4138_p8 = pmov %p4137_p0 }
  0x93   : > { %p4139_p1 = pmov %p4137_p0 }
  0x94   : > { %3409 = vsyncadd (%p4138_p8), [#allocation6], 4294967040 }
  0x95   : > { %3411 = dma.done.wait (%p4139_p1), [#allocation8], 384   ;;  %p4140_p3 = pmov %p4137_p0 }
  0x96   : > { %p4141_p4 = pmov %p4137_p0 }
  0x97   : > { %3413 = vsyncadd (%p4140_p3), [#allocation8], 4294966912 }
  0x98   : > { %3415 = dma.done.wait (%p4141_p4), [#allocation11], 16   ;;  %p4142_p6 = pmov %p4137_p0 }
  0x99   : > { %p4143_p5 = scmp.ne.s32.totalorder %s3577_s30, 0 }
  0x9a   : > { %3417 = vsyncadd (%p4142_p6), [#allocation11], 4294967280  ;;  %v791_v1 = vld [vmem:[#allocation5] sm:$0xff] (!%p4143_p5)  ;;  %vm793_vm0 = vcmask (!%p4143_p5), 261120   ;;  %v792_v2 = vld [vmem:[#allocation5 + $0x8] sm:$0xff] (!%p4143_p5) }
  0x9b   : > { %790 = sbr.rel (%p4143_p5) target bundleno = 162 (0xa2), region = 140  ;;  %794 = vst.msk [vmem:[#allocation2] sm:$0xff] (!%p4143_p5), %vm793_vm0, %v791_v1  ;;  %795 = vst.msk [vmem:[#allocation2 + $0x8] sm:$0xff] (!%p4143_p5), %vm793_vm0, %v792_v2 }
  0xa2 PF: > { %s4144_s8 = sld [smem:[#allocation20_spill]]  ;;  %vm809_vm1 = vcmask 261120   ;;  %v3725_v8 = vld [vmem:[#allocation2] sm:$0xff]  ;;  %s4145_s5 = sld [smem:[#allocation22_spill]]  ;;  %v3743_v15 = vld [vmem:[#allocation2 + $0x8] sm:$0xff]  ;;  %vm1065_vm2 = vcmask 130048  }
  0xa3   : > { %2856 = vmatprep.mubr.msk.f32.mxu1 %vm809_vm1, %v3725_v8  ;;  %2878 = vmatprep.mubr.msk.f32.mxu0 %vm809_vm1, %v3725_v8  ;;  %v2681_v17 = vld [vmem:[#allocation10] ss:$0 sm:$0xff]  ;;  %s3428_s9 = smov 112   ;;  %s4146_s21 = sld [smem:[#allocation23_spill]]  ;;  %vm3758_vm3 = vmpackc.low %vm1065_vm2, %vm1065_vm2  ;;  %v1064_v43 = vld [vmem:[#allocation7 + $0x8] sm:$0xff]  ;;  %vm1740_vm4 = vcmask 523264  }
  0xa4   : > { %s4149_s27 = sld [smem:[#allocation24_spill]]  ;;  %v1063_v46 = vld [vmem:[#allocation7] sm:$0xff]  ;;  %s4150_s20 = sld [smem:[#allocation25_spill]]  ;;  %vm3431_vm5 = vmmov 0  }
  0xa5   : > { %s3429_s0 = smov 16   ;;  %p2717_p7 = scmp.ne.s32.totalorder %s3577_s30, 11 }
  0xa6   : > { %s4152_s1 = sld [smem:[#allocation28_spill]] (!%p2717_p7)  ;;  %s4153_s28 = sld [smem:[#allocation27_spill]] (!%p2717_p7)  ;;  %vm2313_vm6 = vcmask (!%p2717_p7), 7168   ;;  %vm3436_vm7 = vmmov (!%p2717_p7), 0  }
  0xa7   : > { %s4154_s4 = sld [smem:[#allocation29_spill]] (!%p2717_p7)  ;;  %s3435_s3 = smov (!%p2717_p7), 32  }
  0xa8   : > { %v798_v3 = vld [vmem:[%s4144_s8] sm:$0xff]  ;;  %v799_v4 = vld [vmem:[%s4144_s8 + $0x8] sm:$0xff]  ;;  %v800_v5 = vld [vmem:[%s4144_s8 + $0x10] sm:$0xff] }
  0xa9   : > { %v3028_v6 = vpack.c.bf16 %v799_v4, %v798_v3  ;;  %v801_v7 = vld [vmem:[%s4144_s8 + $0x18] sm:$0xff]  ;;  %v891_v10 = vld [vmem:[%s4145_s5] sm:$0xff]  ;;  %v892_v11 = vld [vmem:[%s4145_s5 + $0x8] sm:$0xff] }
  0xaa   : > { %v3032_v9 = vpack.c.bf16 %v801_v7, %v800_v5  ;;  %v3036_v12 = vpack.c.bf16 %v892_v11, %v891_v10  ;;  %v893_v13 = vld [vmem:[%s4145_s5 + $0x10] sm:$0xff]  ;;  %v894_v14 = vld [vmem:[%s4145_s5 + $0x18] sm:$0xff]  ;;  %v2684_v22 = vld [vmem:[%s4146_s21] ss:$0 sm:$0xff] }
  0xab   : > { %3029 = vmatprep.subr.bf16.mxu1 %v3028_v6  ;;  %v3040_v16 = vpack.c.bf16 %v894_v14, %v893_v13  ;;  %v977_v30 = vld [vmem:[%s4149_s27] sm:$0xff]  ;;  %v978_v31 = vld [vmem:[%s4149_s27 + $0x8] sm:$0xff]  ;;  %v979_v32 = vld [vmem:[%s4149_s27 + $0x10] sm:$0xff] }
  0xac   : > { %3031 = vmatpush3.bf16.msra.mxu1 %v3028_v6  ;;  %v3044_v33 = vpack.c.bf16 %v978_v31, %v977_v30  ;;  %v980_v34 = vld [vmem:[%s4149_s27 + $0x18] sm:$0xff]  ;;  %v2687_v7 = vld [vmem:[%s4150_s20] ss:$0 sm:$0xff]  ;;  %s4151_s20 = sld [smem:[#allocation26_spill]] (!%p2717_p7) }
  0xad   : > { %3033 = vmatprep.subr.bf16.mxu1 %v3032_v9  ;;  %v3048_v35 = vpack.c.bf16 %v980_v34, %v979_v32 }
  0xae   : > { %3045 = vmatprep.subr.bf16.mxu0 %v3044_v33 }
  0xaf   : > { %3047 = vmatpush3.bf16.msra.mxu0 %v3044_v33 }
  0xb0   : > { %3035 = vmatpush3.bf16.msra.mxu1 %v3032_v9  ;;  %3049 = vmatprep.subr.bf16.mxu0 %v3048_v35 }
  0xb1   : > { %3037 = vmatprep.subr.bf16.mxu1 %v3036_v12 }
  0xb3   : > { %2857 = vmatmul.mubr.msk.f32.vlgmr.msra.gmra.mrb[0].mxu1 %vm809_vm1, %v3743_v15  ;;  %3051 = vmatpush3.bf16.msra.mxu0 %v3048_v35 }
  0xb4   : > { %3039 = vmatpush3.bf16.msra.mxu1 %v3036_v12  ;;  %2867 = vmatprep.mubr.msk.f32.mxu1 %vm809_vm1, %v3725_v8 }
  0xb5   : > { %3041 = vmatprep.subr.bf16.mxu1 %v3040_v16 }
  0xb6   : > { %2879 = vmatmul.mubr.msk.f32.vlgmr.msra.gmra.mrb[0].mxu0 %vm809_vm1, %v3743_v15 }
  0xb8   : > { %3043 = vmatpush3.bf16.msra.mxu1 %v3040_v16 }
  0xbb   : > { %2868 = vmatmul.mubr.msk.f32.vlgmr.msra.gmra.mrb[2].mxu1 %vm809_vm1, %v3743_v15 }
 0x186   : > { %v2858_v18 = vpop.f32.mrb[0].mxu1 }
 0x187   : > { %v888_v19 = vadd.f32 %v2858_v18, %v2681_v17  ;;  %v882_v20 = vpop.f32.mrb[1].mxu1 }
 0x188   : > { %v883_v21 = vadd.f32 %v2681_v17, %v882_v20 }
 0x189   : > { %1262 = vrot.lane.b32.xlu1 %v888_v19, %s3428_s9  ;;  %v2880_v6 = vpop.f32.mrb[0].mxu0 }
 0x18a   : > { %2885 = vmatprep.mubr.msk.f32.mxu1 %vm1065_vm2, %v883_v21  ;;  %v1054_v9 = vpop.f32.mrb[1].mxu0  ;;  %v1060_v10 = vadd.f32 %v2880_v6, %v2687_v7 }
 0x18b   : > { %v1055_v11 = vadd.f32 %v2687_v7, %v1054_v9 }
 0x18d   : > { %v3201_v12 = vpack.i.bf16 %v1060_v10, %v1055_v11  ;;  %v3058_v13 = vpack.c.bf16 %v1060_v10, %v1055_v11  ;;  %v1616_v10 = vld [vmem:[%s4088_s14 + $0x8] sm:$0xff] }
 0x18e   : > { %v2869_v23 = vpop.f32.mrb[2].mxu1 }
 0x18f   : > { %v974_v24 = vadd.f32 %v2869_v23, %v2684_v22  ;;  %v968_v25 = vpop.f32.mrb[3].mxu1  ;;  %3059 = vmatprep.subr.bf16.mxu0 %v3058_v13 }
 0x190   : > { %v969_v26 = vadd.f32 %v2684_v22, %v968_v25  ;;  %3061 = vmatpush3.bf16.msra.mxu0 %v3058_v13  ;;  %v1618_v13 = vld [vmem:[%s4088_s14 + $0x18] sm:$0xff] }
 0x192   : > { %v3052_v28 = vpack.c.bf16 %v974_v24, %v969_v26  ;;  %v3196_v29 = vpack.i.bf16 %v974_v24, %v969_v26 }
 0x194   : > { %3197 = vrot.lane.b32.xlu0 %v3196_v29, %s3428_s9  ;;  %3054 = vmatprep.subr.msk.bf16.mxu1 %vm3758_vm3, %v3052_v28 }
 0x195   : > { %3057 = vmatpush3.bf16.xpose.msk.msra.mxu1 %vm3758_vm3, %v3052_v28 }
 0x198   : > { %1260 = vrot.lane.b32.xlu0 %v883_v21, %s3428_s9 }
 0x19c   : > { %2886 = vmatmul.mubr.msk.f32.vlgmr.msra.gmra.mrb[4].mxu1 %vm1065_vm2, %v888_v19 }
 0x1fb   : > { %v1263_v41 = vpop.permute.xlu1 %1262 }
 0x206   : > { %v3198_v36 = vpop.permute.xlu0 %3197 }
 0x207   : > { %v3200_v37 = vunpack.i.h.bf16 %v3198_v36  ;;  %v3199_v38 = vunpack.i.l.bf16 %v3198_v36 }
 0x209   : > { %v3062_v39 = vpack.c.bf16 %v3200_v37, %v3199_v38 }
 0x20a   : > { %v1261_v40 = vpop.permute.xlu0 %1260 }
 0x20b   : > { %3064 = vmatprep.subr.msk.bf16.mxu1 %vm3758_vm3, %v3062_v39  ;;  %2899 = vmatprep.mubr.msk.f32.mxu1 %vm1065_vm2, %v1261_v40 }
 0x20c   : > { %3067 = vmatpush3.bf16.xpose.msk.msra.mxu1 %vm3758_vm3, %v3062_v39 }
 0x213   : > { %2900 = vmatmul.mubr.msk.f32.vlgmr.msra.gmra.mrb[6].mxu1 %vm1065_vm2, %v1263_v41  ;;  %v1476_v41 = vld [vmem:[%s4084_s10] sm:$0xff] }
 0x26f   : > { %v2887_v42 = vpop.f32.mrb[4].mxu1 }
 0x270   : > { %v1154_v44 = vmul.f32 0.25, %v2887_v42  ;;  %v1144_v45 = vpop.f32.mrb[5].mxu1  ;;  %v1477_v42 = vld [vmem:[%s4084_s10 + $0x8] sm:$0xff] }
 0x271   : > { %v1153_v47 = vmul.f32 0.25, %v1144_v45 }
 0x272   : > { %v1156_v48 = vadd.f32 %v1154_v44, %v1064_v43 }
 0x273   : > { %v1155_v49 = vadd.f32 %v1153_v47, %v1063_v46  ;;  %v1479_v47 = vld [vmem:[%s4084_s10 + $0x18] sm:$0xff] }
 0x274   : > { %v1160_v50 = vsel %vm1065_vm2, %v1156_v48, -inf }
 0x275   : > { %1161 = vmax.xlane.f32.xlu0 %v1160_v50  ;;  %v1157_v51 = vsel %vm1065_vm2, %v1155_v49, -inf }
 0x276   : > { %1158 = vmax.xlane.f32.xlu1 %v1157_v51 }
 0x2e6   : > { %v2901_v52 = vpop.f32.mrb[6].mxu1 }
 0x2e7   : > { %v1352_v53 = vmul.f32 0.25, %v2901_v52  ;;  %v1342_v54 = vpop.f32.mrb[7].mxu1 }
 0x2e8   : > { %v1351_v55 = vmul.f32 0.25, %v1342_v54 }
 0x2e9   : > { %v1354_v56 = vadd.f32 %v1352_v53, %v1064_v43  ;;  %v3072_v43 = vpack.c.bf16 %v1477_v42, %v1476_v41  ;;  %v1731_v41 = vld [vmem:[%s4090_s16 + $0x30] sm:$0xff]  ;;  %v1732_v42 = vld [vmem:[%s4090_s16 + $0x38] sm:$0xff] }
 0x2ea   : > { %v1353_v57 = vadd.f32 %v1351_v55, %v1063_v46  ;;  %v1478_v46 = vld [vmem:[%s4084_s10 + $0x10] sm:$0xff]  ;;  %v2702_v55 = vld [vmem:[%s4085_s11] ss:$0 sm:$0xff] }
 0x2eb   : > { %v1358_v58 = vsel %vm1065_vm2, %v1354_v56, -inf }
 0x2ec   : > { %1359 = vmax.xlane.f32.xlu1 %v1358_v58  ;;  %v1355_v59 = vsel %vm1065_vm2, %v1353_v57, -inf }
 0x2ed   : > { %1356 = vmax.xlane.f32.xlu0 %v1355_v59 }
 0x302   : > { %v1162_v60 = vpop.xlane.xlu0 %1161 }
 0x303   : > { %v1164_v61 = vsub.f32 %v1156_v48, %v1162_v60  ;;  %v1159_v62 = vpop.xlane.xlu1 %1158  ;;  %v3076_v48 = vpack.c.bf16 %v1479_v47, %v1478_v46 }
 0x304   : > { %v1163_v63 = vsub.f32 %v1155_v49, %v1159_v62 }
 0x305   : > { %v1167_v0 = vmul.f32 1.442695, %v1164_v61 }
 0x306   : > { %v1165_v1 = vmul.f32 1.442695, %v1163_v63 }
 0x307   : > { %3206 = vpow2.f32 %v1167_v0 }
 0x308   : > { %3208 = vpow2.f32 %v1165_v1 }
 0x311   : > { %v3207_v2 = vpop.eup %3206 }
 0x312   : > { %v3209_v3 = vpop.eup %3208  ;;  %v1172_v4 = vsel %vm1065_vm2, %v3207_v2, 0.0 }
 0x313   : > { %1173 = vadd.xlane.f32.xlu1 %v1172_v4  ;;  %v1169_v5 = vsel %vm1065_vm2, %v3209_v3, 0.0 }
 0x314   : > { %1170 = vadd.xlane.f32.xlu0 %v1169_v5 }
 0x379   : > { %v1360_v14 = vpop.xlane.xlu1 %1359 }
 0x37a   : > { %v1362_v16 = vsub.f32 %v1354_v56, %v1360_v14  ;;  %v1357_v17 = vpop.xlane.xlu0 %1356 }
 0x37b   : > { %v1361_v18 = vsub.f32 %v1353_v57, %v1357_v17 }
 0x37c   : > { %v1365_v19 = vmul.f32 1.442695, %v1362_v16 }
 0x37d   : > { %v1363_v20 = vmul.f32 1.442695, %v1361_v18 }
 0x37e   : > { %3210 = vpow2.f32 %v1365_v19 }
 0x37f   : > { %3212 = vpow2.f32 %v1363_v20 }
 0x388   : > { %v3211_v21 = vpop.eup %3210 }
 0x389   : > { %v3213_v22 = vpop.eup %3212  ;;  %v1370_v23 = vsel %vm1065_vm2, %v3211_v21, 0.0 }
 0x38a   : > { %1371 = vadd.xlane.f32.xlu1 %v1370_v23  ;;  %v1367_v24 = vsel %vm1065_vm2, %v3213_v22, 0.0  ;;  %v2705_v23 = vld [vmem:[%s4086_s12] ss:$0 sm:$0xff] }
 0x38b   : > { %1368 = vadd.xlane.f32.xlu0 %v1367_v24 }
 0x3a0   : > { %v1174_v25 = vpop.xlane.xlu1 %1173 }
 0x3a1   : > { %3214 = vrcp.f32 %v1174_v25  ;;  %v1171_v26 = vpop.xlane.xlu0 %1170  ;;  %3202 = vrot.lane.b32.xlu0 %v3201_v12, %s3428_s9  ;;  %v1617_v12 = vld [vmem:[%s4088_s14 + $0x10] sm:$0xff]  ;;  %v2706_v25 = vld [vmem:[%s4087_s13] ss:$0 sm:$0xff] }
 0x3a2   : > { %3216 = vrcp.f32 %v1171_v26  ;;  %v3084_v14 = vpack.c.bf16 %v1618_v13, %v1617_v12 }
 0x3ab   : > { %v3215_v27 = vpop.eup %3214 }
 0x3ac   : > { %v3217_v28 = vpop.eup %3216  ;;  %v1178_v30 = vmul.f32 %v3215_v27, %v3207_v2 }
 0x3ad   : > { %v1177_v29 = vmul.f32 %v3217_v28, %v3209_v3 }
 0x3af   : > { %2892 = vmatprep.mubr.msk.f32.mxu0 %vm1065_vm2, %v1177_v29 }
 0x3b0   : > { %2893 = vmatmul.mubr.msk.f32.vlgmr.msra.gmra.mrb[2].mxu0 %vm1065_vm2, %v1178_v30 }
 0x417   : > { %v1372_v31 = vpop.xlane.xlu1 %1371 }
 0x418   : > { %3218 = vrcp.f32 %v1372_v31  ;;  %v1369_v32 = vpop.xlane.xlu0 %1368 }
 0x419   : > { %3220 = vrcp.f32 %v1369_v32  ;;  %v1725_v32 = vld [vmem:[%s4090_s16] sm:$0xff] }
 0x41c   : > { %v3203_v33 = vpop.permute.xlu0 %3202 }
 0x41d   : > { %v3205_v34 = vunpack.i.h.bf16 %v3203_v33  ;;  %v3204_v35 = vunpack.i.l.bf16 %v3203_v33  ;;  %v1726_v33 = vld [vmem:[%s4090_s16 + $0x8] sm:$0xff] }
 0x41f   : > { %v3068_v36 = vpack.c.bf16 %v3205_v34, %v3204_v35  ;;  %v3088_v34 = vpack.c.bf16 %v1726_v33, %v1725_v32  ;;  %v1727_v35 = vld [vmem:[%s4090_s16 + $0x10] sm:$0xff] }
 0x421   : > { %3069 = vmatprep.subr.bf16.mxu0 %v3068_v36 }
 0x422   : > { %v3219_v37 = vpop.eup %3218  ;;  %3071 = vmatpush3.bf16.msra.mxu0 %v3068_v36  ;;  %v1728_v36 = vld [vmem:[%s4090_s16 + $0x18] sm:$0xff] }
 0x423   : > { %v3221_v38 = vpop.eup %3220  ;;  %v1376_v40 = vmul.f32 %v3219_v37, %v3211_v21  ;;  %3073 = vmatprep.subr.bf16.mxu0 %v3072_v43  ;;  %v3092_v37 = vpack.c.bf16 %v1728_v36, %v1727_v35  ;;  %v2714_v35 = vld [vmem:[%s4093_s19] ss:$0 sm:$0xff] }
 0x424   : > { %v1375_v39 = vmul.f32 %v3221_v38, %v3213_v22  ;;  %v1729_v38 = vld [vmem:[%s4090_s16 + $0x20] sm:$0xff] }
 0x426   : > { %2906 = vmatprep.mubr.msk.f32.mxu0 %vm1065_vm2, %v1375_v39  ;;  %v1730_v39 = vld [vmem:[%s4090_s16 + $0x28] sm:$0xff] }
 0x427   : > { %2907 = vmatmul.mubr.msk.f32.vlgmr.msra.gmra.mrb[4].mxu0 %vm1065_vm2, %v1376_v40  ;;  %v3096_v40 = vpack.c.bf16 %v1730_v39, %v1729_v38 }
 0x428   : > { %3075 = vmatpush3.bf16.msra.mxu0 %v3072_v43  ;;  %v3100_v43 = vpack.c.bf16 %v1732_v42, %v1731_v41  ;;  %v1870_v41 = vld [vmem:[#allocation9] sm:$0xff] }
 0x429   : > { %3077 = vmatprep.subr.bf16.mxu0 %v3076_v48 }
 0x42c   : > { %3079 = vmatpush3.bf16.msra.mxu0 %v3076_v48 }
 0x42d   : > { %3089 = vmatprep.subr.bf16.mxu0 %v3088_v34 }
 0x483   : > { %v2894_v44 = vpop.f32.mrb[2].mxu0 }
 0x484   : > { %v1251_v45 = vpop.f32.mrb[3].mxu0 }
 0x4fa   : > { %v2908_v49 = vpop.f32.mrb[4].mxu0 }
 0x4fb   : > { %v1457_v50 = vpop.f32.mrb[5].mxu0 }
 0x4fc   : > { %1468 = vrot.lane.b32.xlu1 %v1457_v50, %s3429_s0 }
 0x500   : > { %1470 = vrot.lane.b32.xlu1 %v2908_v49, %s3429_s0  ;;  %s2716_s0 = sshll.u32 %s3577_s30, 3 }
 0x501   : > { %s1945_s6 = scalar_lea.vmem [#allocation3], %s2716_s0 }
 0x56e   : > { %v1469_v51 = vpop.permute.xlu1 %1468 }
 0x56f   : > { %v1474_v52 = vsel %vm1065_vm2, %v1251_v45, %v1469_v51 }
 0x570   : > { %2917 = vmatprep.mubr.msk.f32.mxu0 %vm809_vm1, %v1474_v52 }
 0x572   : > { %v1471_v53 = vpop.permute.xlu1 %1470 }
 0x573   : > { %v1475_v54 = vsel %vm1065_vm2, %v2894_v44, %v1471_v53  ;;  %v2707_v44 = vld [vmem:[%s4089_s15] ss:$0 sm:$0xff] }
 0x574   : > { %2918 = vmatmul.mubr.msk.f32.vlgmr.msra.gmra.mrb[6].mxu0 %vm809_vm1, %v1475_v54 }
 0x575   : > { %3091 = vmatpush3.bf16.msra.mxu0 %v3088_v34 }
 0x576   : > { %3093 = vmatprep.subr.bf16.mxu0 %v3092_v37 }
 0x579   : > { %3095 = vmatpush3.bf16.msra.mxu0 %v3092_v37 }
 0x57a   : > { %3097 = vmatprep.subr.bf16.mxu0 %v3096_v40 }
 0x57d   : > { %3099 = vmatpush3.bf16.msra.mxu0 %v3096_v40 }
 0x57e   : > { %3101 = vmatprep.subr.bf16.mxu0 %v3100_v43 }
 0x581   : > { %3103 = vmatpush3.bf16.msra.mxu0 %v3100_v43 }
 0x647   : > { %v2919_v56 = vpop.f32.mrb[6].mxu0 }
 0x648   : > { %v1565_v57 = vadd.f32 %v2919_v56, %v2702_v55  ;;  %v1559_v58 = vpop.f32.mrb[7].mxu0 }
 0x649   : > { %v1560_v59 = vadd.f32 %v2702_v55, %v1559_v58 }
 0x64a   : > { %v1569_v60 = vadd.f32 %v1565_v57, %v3743_v15 }
 0x64b   : > { %v1568_v61 = vadd.f32 %v1560_v59, %v3725_v8  ;;  %v1615_v8 = vld [vmem:[%s4088_s14] sm:$0xff] }
 0x64c   : > { %v1575_v62 = vsel %vm809_vm1, %v1569_v60, 0.0  ;;  %v3080_v11 = vpack.c.bf16 %v1616_v10, %v1615_v8 }
 0x64d   : > { %1576 = vadd.xlane.f32.xlu1 %v1575_v62  ;;  %v1572_v63 = vsel %vm809_vm1, %v1568_v61, 0.0 }
 0x64e   : > { %1573 = vadd.xlane.f32.xlu0 %v1572_v63  ;;  %3081 = vmatprep.subr.bf16.mxu1 %v3080_v11 }
 0x64f   : > { %3083 = vmatpush3.bf16.msra.mxu1 %v3080_v11 }
 0x650   : > { %3085 = vmatprep.subr.bf16.mxu1 %v3084_v14 }
 0x653   : > { %3087 = vmatpush3.bf16.msra.mxu1 %v3084_v14 }
 0x6da   : > { %v1577_v0 = vpop.xlane.xlu1 %1576 }
 0x6db   : > { %v1580_v1 = vmul.f32 0.03125, %v1577_v0  ;;  %v1574_v2 = vpop.xlane.xlu0 %1573 }
 0x6dc   : > { %v1579_v3 = vmul.f32 0.03125, %v1574_v2 }
 0x6dd   : > { %v1582_v4 = vsub.f32 %v1569_v60, %v1580_v1 }
 0x6de   : > { %v1581_v5 = vsub.f32 %v1568_v61, %v1579_v3  ;;  %v2710_v3 = vld [vmem:[%s4091_s17] ss:$0 sm:$0xff] }
 0x6df   : > { %v1584_v9 = vmul.f32 %v1582_v4, %v1582_v4 }
 0x6e0   : > { %v1583_v6 = vmul.f32 %v1581_v5, %v1581_v5 }
 0x6e1   : > { %v1588_v15 = vsel %vm809_vm1, %v1584_v9, 0.0 }
 0x6e2   : > { %v1585_v7 = vsel %vm809_vm1, %v1583_v6, 0.0 }
 0x6e3   : > { %1586 = vadd.xlane.f32.xlu0 %v1585_v7 }
 0x6e7   : > { %1589 = vadd.xlane.f32.xlu0 %v1588_v15 }
 0x770   : > { %v1587_v16 = vpop.xlane.xlu0 %1586 }
 0x771   : > { %v1591_v17 = vmul.f32 0.03125, %v1587_v16 }
 0x773   : > { %v1593_v18 = vadd.f32 1e-12, %v1591_v17 }
 0x774   : > { %v1590_v19 = vpop.xlane.xlu0 %1589 }
 0x775   : > { %3222 = vrsqrt.f32 %v1593_v18  ;;  %v1592_v20 = vmul.f32 0.03125, %v1590_v19 }
 0x777   : > { %v1594_v21 = vadd.f32 1e-12, %v1592_v20 }
 0x779   : > { %3224 = vrsqrt.f32 %v1594_v21 }
 0x77f   : > { %v3223_v22 = vpop.eup %3222 }
 0x780   : > { %v1597_v24 = vmul.f32 %v3223_v22, %v1581_v5  ;;  %v3430_v22 = vmov 0.0|0.0  }
 0x781   : > { %3104 = vmatprep.subr.bf16.mxu1 %v3430_v22 }
 0x782   : > { %v1605_v26 = vmul.f32 %v2705_v23, %v1597_v24 }
 0x783   : > { %v3225_v27 = vpop.eup %3224 }
 0x784   : > { %v1598_v28 = vmul.f32 %v3225_v27, %v1582_v4  ;;  %v1613_v29 = vadd.f32 %v2706_v25, %v1605_v26 }
 0x786   : > { %v1606_v30 = vmul.f32 %v2705_v23, %v1598_v28  ;;  %2928 = vmatprep.mubr.msk.f32.mxu1 %vm809_vm1, %v1613_v29  ;;  %v3432_v23 = vmov 0.0  }
 0x788   : > { %v1614_v31 = vadd.f32 %v2706_v25, %v1606_v30 }
 0x78a   : > { %2929 = vmatmul.mubr.msk.f32.vlgmr.msra.gmra.mrb[8].mxu1 %vm809_vm1, %v1614_v31 }
 0x78b   : > { %2954 = vmatprep.mubr.msk.f32.mxu1 %vm3431_vm5, %v3432_v23 }
 0x85d   : > { %v2930_v45 = vpop.f32.mrb[8].mxu1 }
 0x85e   : > { %v1704_v46 = vadd.f32 %v2930_v45, %v2707_v44  ;;  %v1698_v47 = vpop.f32.mrb[9].mxu1  ;;  %v1965_v45 = vld [vmem:[%s4151_s20 + $0x8] sm:$0xff] (!%p2717_p7) }
 0x85f   : > { %v1699_v48 = vadd.f32 %v2707_v44, %v1698_v47  ;;  %v1964_v44 = vld [vmem:[%s4151_s20] sm:$0xff] (!%p2717_p7) }
 0x860   : > { %v1708_v49 = vmul.f32 %v1704_v46, %v1704_v46  ;;  %v3107_v47 = vpack.c.bf16 (!%p2717_p7), %v1965_v45, %v1964_v44 }
 0x861   : > { %v1707_v50 = vmul.f32 %v1699_v48, %v1699_v48 }
 0x862   : > { %v1710_v51 = vmul.f32 %v1708_v49, %v1704_v46  ;;  %3108 = vmatprep.subr.bf16.mxu0 (!%p2717_p7), %v3107_v47 }
 0x863   : > { %v1709_v52 = vmul.f32 %v1707_v50, %v1699_v48 }
 0x864   : > { %v1712_v53 = vmul.f32 0.044715, %v1710_v51 }
 0x865   : > { %v1711_v54 = vmul.f32 0.044715, %v1709_v52 }
 0x866   : > { %v1714_v55 = vadd.f32 %v1712_v53, %v1704_v46 }
 0x867   : > { %v1713_v56 = vadd.f32 %v1711_v54, %v1699_v48 }
 0x868   : > { %v1716_v57 = vmul.f32 0.7978846, %v1714_v55 }
 0x869   : > { %v1715_v58 = vmul.f32 0.7978846, %v1713_v56 }
 0x86a   : > { %3226 = vtanh.f32 %v1716_v57 }
 0x86b   : > { %3228 = vtanh.f32 %v1715_v58 }
 0x874   : > { %v3227_v59 = vpop.eup %3226 }
 0x875   : > { %v3229_v60 = vpop.eup %3228  ;;  %v1720_v61 = vadd.f32 1.0, %v3227_v59 }
 0x876   : > { %v1719_v62 = vadd.f32 1.0, %v3229_v60 }
 0x877   : > { %v1722_v63 = vmul.f32 0.5, %v1720_v61 }
 0x878   : > { %v1721_v0 = vmul.f32 0.5, %v1719_v62  ;;  %v2148_v62 = vld [vmem:[%s4152_s1] sm:$0xff] (!%p2717_p7) }
 0x879   : > { %v1724_v2 = vmul.f32 %v1722_v63, %v1704_v46  ;;  %v1966_v46 = vld [vmem:[%s4151_s20 + $0x10] sm:$0xff] (!%p2717_p7)  ;;  %v2149_v63 = vld [vmem:[%s4152_s1 + $0x8] sm:$0xff] (!%p2717_p7) }
 0x87a   : > { %v1723_v1 = vmul.f32 %v1721_v0, %v1699_v48  ;;  %v1967_v48 = vld [vmem:[%s4151_s20 + $0x18] sm:$0xff] (!%p2717_p7)  ;;  %v3115_v0 = vpack.c.bf16 (!%p2717_p7), %v2149_v63, %v2148_v62 }
 0x87b   : > { %v3111_v50 = vpack.c.bf16 (!%p2717_p7), %v1967_v48, %v1966_v46 }
 0x87c   : > { %2947 = vmatprep.mubr.msk.f32.mxu0 %vm1740_vm4, %v1723_v1  ;;  %v2150_v1 = vld [vmem:[%s4152_s1 + $0x10] sm:$0xff] (!%p2717_p7) }
 0x87d   : > { %2948 = vmatmul.mubr.msk.f32.vlgmr.msra.gmra.mrb[8].mxu0 %vm1740_vm4, %v1724_v2  ;;  %v2151_v2 = vld [vmem:[%s4152_s1 + $0x18] sm:$0xff] (!%p2717_p7) }
 0x87e   : > { %3110 = vmatpush3.bf16.msra.mxu0 (!%p2717_p7), %v3107_v47 }
 0x87f   : > { %3112 = vmatprep.subr.bf16.mxu0 (!%p2717_p7), %v3111_v50 }
 0x882   : > { %3114 = vmatpush3.bf16.msra.mxu0 (!%p2717_p7), %v3111_v50 }
 0x950   : > { %v2949_v4 = vpop.f32.mrb[8].mxu0 }
 0x951   : > { %v1819_v5 = vadd.f32 %v2949_v4, %v2710_v3  ;;  %v1813_v6 = vpop.f32.mrb[9].mxu0  ;;  %v2718_v4 = vld [vmem:[%s4153_s28] ss:$0 sm:$0xff] (!%p2717_p7)  ;;  %s4155_s28 = sld [smem:[#allocation19_spill]] (!%p2717_p7) }
 0x952   : > { %v1814_v7 = vadd.f32 %v2710_v3, %v1813_v6  ;;  %v3119_v3 = vpack.c.bf16 (!%p2717_p7), %v2151_v2, %v2150_v1 }
 0x953   : > { %v1823_v9 = vadd.f32 %v1819_v5, %v1614_v31  ;;  %v2713_v31 = vld [vmem:[%s4092_s18] ss:$0 sm:$0xff] }
 0x954   : > { %v1822_v15 = vadd.f32 %v1814_v7, %v1613_v29 }
 0x955   : > { %v1829_v8 = vsel %vm809_vm1, %v1823_v9, 0.0 }
 0x956   : > { %1830 = vadd.xlane.f32.xlu0 %v1829_v8  ;;  %v1826_v10 = vsel %vm809_vm1, %v1822_v15, 0.0 }
 0x957   : > { %1827 = vadd.xlane.f32.xlu1 %v1826_v10 }
 0x9e3   : > { %v1831_v11 = vpop.xlane.xlu0 %1830 }
 0x9e4   : > { %v1833_v12 = vmul.f32 0.03125, %v1831_v11  ;;  %v1828_v13 = vpop.xlane.xlu1 %1827 }
 0x9e5   : > { %v1832_v14 = vmul.f32 0.03125, %v1828_v13 }
 0x9e6   : > { %v1835_v16 = vsub.f32 %v1823_v9, %v1833_v12 }
 0x9e7   : > { %v1834_v17 = vsub.f32 %v1822_v15, %v1832_v14 }
 0x9e8   : > { %v1837_v18 = vmul.f32 %v1835_v16, %v1835_v16 }
 0x9e9   : > { %v1836_v19 = vmul.f32 %v1834_v17, %v1834_v17 }
 0x9ea   : > { %v1841_v20 = vsel %vm809_vm1, %v1837_v18, 0.0 }
 0x9eb   : > { %1842 = vadd.xlane.f32.xlu0 %v1841_v20  ;;  %v1838_v21 = vsel %vm809_vm1, %v1836_v19, 0.0 }
 0x9ec   : > { %1839 = vadd.xlane.f32.xlu1 %v1838_v21 }
 0xa78   : > { %v1843_v24 = vpop.xlane.xlu0 %1842 }
 0xa79   : > { %v1845_v25 = vmul.f32 0.03125, %v1843_v24  ;;  %v1840_v26 = vpop.xlane.xlu1 %1839 }
 0xa7a   : > { %v1844_v27 = vmul.f32 0.03125, %v1840_v26 }
 0xa7b   : > { %v1847_v28 = vadd.f32 1e-12, %v1845_v25 }
 0xa7c   : > { %v1846_v29 = vadd.f32 1e-12, %v1844_v27 }
 0xa7d   : > { %3230 = vrsqrt.f32 %v1847_v28 }
 0xa7e   : > { %3232 = vrsqrt.f32 %v1846_v29 }
 0xa87   : > { %v3231_v30 = vpop.eup %3230 }
 0xa88   : > { %v3233_v32 = vpop.eup %3232  ;;  %v1851_v33 = vmul.f32 %v3231_v30, %v1835_v16 }
 0xa89   : > { %v1850_v34 = vmul.f32 %v3233_v32, %v1834_v17 }
 0xa8a   : > { %v1859_v36 = vmul.f32 %v2713_v31, %v1851_v33 }
 0xa8b   : > { %v1858_v37 = vmul.f32 %v2713_v31, %v1850_v34 }
 0xa8c   : > { %v1867_v38 = vadd.f32 %v2714_v35, %v1859_v36 }
 0xa8d   : > { %v1866_v39 = vadd.f32 %v2714_v35, %v1858_v37 }
 0xa8e   : > { %1869 = vst.msk [vmem:[#allocation2 + $0x8] sm:$0xff] %vm809_vm1, %v1867_v38 }
 0xa8f   : > { %1868 = vst.msk [vmem:[#allocation2] sm:$0xff] %vm809_vm1, %v1866_v39  ;;  %v3105_v40 = vpack.c.bf16 %v1867_v38, %v1866_v39 }
 0xa91   : > { %3106 = vmatpush3.bf16.msra.mxu1 %v3105_v40 }
 0xa92   : > { %3116 = vmatprep.subr.bf16.mxu1 (!%p2717_p7), %v3115_v0 }
 0xa94   : > { %2955 = vmatmul.mubr.msk.f32.vlgmr.msra.gmra.mrb[10].mxu1 %vm1065_vm2, %v1870_v41  ;;  %v3433_v41 = vmov (!%p2717_p7), 0  }
 0xa95   : > { %3118 = vmatpush3.bf16.msra.mxu1 (!%p2717_p7), %v3115_v0  ;;  %3235 = vset.pattern.permute.xlu1 (!%p2717_p7), %v3433_v41 }
 0xa96   : > { %3120 = vmatprep.subr.bf16.mxu1 (!%p2717_p7), %v3119_v3  ;;  %3234 = vset.pattern.permute.xlu0 (!%p2717_p7), %v3433_v41 }
 0xa99   : > { %3122 = vmatpush3.bf16.msra.mxu1 (!%p2717_p7), %v3119_v3 }
 0xb62   : > { %1950 = sbr.rel (%p2717_p7) target bundleno = 3852 (0xf0c), region = 144 }
 0xb67   : > { %v1940_v42 = vpop.f32.mrb[10].mxu1 }
 0xb68   : > { %1946 = vst.msk [vmem:[%s1945_s6] sm:$0xff] %vm809_vm1, %v1940_v42  ;;  %v2956_v43 = vpop.f32.mrb[11].mxu1 }
 0xb6f   : > { %v3910_v49 = vld [vmem:[#allocation3] sm:$0xff]  ;;  %v3914_v51 = vld [vmem:[#allocation3 + $0x8] sm:$0xff]  ;;  %v3916_v52 = vld [vmem:[#allocation3 + $0x10] sm:$0xff] }
 0xb70   : > { %2965 = vmatprep.mubr.msk.f32.mxu0 %vm809_vm1, %v3910_v49  ;;  %v3922_v53 = vld [vmem:[#allocation3 + $0x18] sm:$0xff]  ;;  %v3924_v54 = vld [vmem:[#allocation3 + $0x20] sm:$0xff]  ;;  %v3930_v55 = vld [vmem:[#allocation3 + $0x28] sm:$0xff] }
 0xb71   : > { %2966 = vmatmul.mubr.msk.f32.vlgmr.msra.gmra.mrb[0].mxu0 %vm809_vm1, %v3914_v51  ;;  %v3932_v56 = vld [vmem:[#allocation3 + $0x30] sm:$0xff]  ;;  %v3938_v57 = vld [vmem:[#allocation3 + $0x38] sm:$0xff]  ;;  %v3940_v58 = vld [vmem:[#allocation3 + $0x40] sm:$0xff] }
 0xb72   : > { %2968 = vmatprep.mubr.msk.f32.mxu0 %vm809_vm1, %v3916_v52  ;;  %v3946_v59 = vld [vmem:[#allocation3 + $0x48] sm:$0xff]  ;;  %v3948_v60 = vld [vmem:[#allocation3 + $0x50] sm:$0xff]  ;;  %v3954_v61 = vld [vmem:[#allocation3 + $0x58] sm:$0xff] }
 0xb75   : > { %2969 = vmatmul.mubr.msk.f32.gmra.mrb[2].mxu0 %vm809_vm1, %v3922_v53 }
 0xb76   : > { %2971 = vmatprep.mubr.msk.f32.mxu0 %vm809_vm1, %v3924_v54 }
 0xb79   : > { %2972 = vmatmul.mubr.msk.f32.gmra.mrb[4].mxu0 %vm809_vm1, %v3930_v55 }
 0xb7a   : > { %2974 = vmatprep.mubr.msk.f32.mxu0 %vm809_vm1, %v3932_v56 }
 0xb7d   : > { %2975 = vmatmul.mubr.msk.f32.gmra.mrb[6].mxu0 %vm809_vm1, %v3938_v57 }
 0xb7e   : > { %2977 = vmatprep.mubr.msk.f32.mxu0 %vm809_vm1, %v3940_v58 }
 0xb81   : > { %2978 = vmatmul.mubr.msk.f32.gmra.mrb[8].mxu0 %vm809_vm1, %v3946_v59 }
 0xb82   : > { %2980 = vmatprep.mubr.msk.f32.mxu0 %vm809_vm1, %v3948_v60 }
 0xb85   : > { %2981 = vmatmul.mubr.msk.f32.gmra.mrb[10].mxu0 %vm809_vm1, %v3954_v61 }
 0xc44   : > { %v2967_v5 = vpop.f32.mrb[0].mxu0 }
 0xc45   : > { %v2083_v6 = vadd.f32 %v2967_v5, %v2718_v4  ;;  %v2077_v7 = vpop.f32.mrb[1].mxu0 }
 0xc46   : > { %v2078_v9 = vadd.f32 %v2718_v4, %v2077_v7 }
 0xc48   : > { %3236 = vtanh.f32 %v2078_v9  ;;  %v2970_v15 = vpop.f32.mrb[2].mxu0 }
 0xc49   : > { %3238 = vtanh.f32 %v2083_v6  ;;  %v2093_v8 = vadd.f32 %v2970_v15, %v2718_v4  ;;  %v2087_v10 = vpop.f32.mrb[3].mxu0 }
 0xc4a   : > { %v2088_v11 = vadd.f32 %v2718_v4, %v2087_v10 }
 0xc4c   : > { %3240 = vtanh.f32 %v2088_v11  ;;  %v2973_v12 = vpop.f32.mrb[4].mxu0 }
 0xc4d   : > { %3242 = vtanh.f32 %v2093_v8  ;;  %v2103_v13 = vadd.f32 %v2973_v12, %v2718_v4  ;;  %v2097_v14 = vpop.f32.mrb[5].mxu0 }
 0xc4e   : > { %v2098_v16 = vadd.f32 %v2718_v4, %v2097_v14 }
 0xc50   : > { %3244 = vtanh.f32 %v2098_v16  ;;  %v2976_v17 = vpop.f32.mrb[6].mxu0 }
 0xc51   : > { %3246 = vtanh.f32 %v2103_v13  ;;  %v2113_v18 = vadd.f32 %v2976_v17, %v2718_v4  ;;  %v2107_v19 = vpop.f32.mrb[7].mxu0 }
 0xc52   : > { %v3237_v20 = vpop.eup %3236  ;;  %v2108_v21 = vadd.f32 %v2718_v4, %v2107_v19 }
 0xc53   : > { %v3239_v22 = vpop.eup %3238  ;;  %2991 = vmatprep.mubr.msk.f32.mxu1 %vm809_vm1, %v3237_v20 }
 0xc54   : > { %3248 = vtanh.f32 %v2108_v21  ;;  %v2979_v23 = vpop.f32.mrb[8].mxu0  ;;  %2992 = vmatmul.mubr.msk.f32.vlgmr.msra.gmra.mrb[0].mxu1 %vm809_vm1, %v3239_v22 }
 0xc55   : > { %3250 = vtanh.f32 %v2113_v18  ;;  %v2123_v24 = vadd.f32 %v2979_v23, %v2718_v4  ;;  %v2117_v25 = vpop.f32.mrb[9].mxu0 }
 0xc56   : > { %v3241_v26 = vpop.eup %3240  ;;  %v2118_v27 = vadd.f32 %v2718_v4, %v2117_v25 }
 0xc57   : > { %v3243_v28 = vpop.eup %3242  ;;  %2994 = vmatprep.mubr.msk.f32.mxu1 %vm809_vm1, %v3241_v26 }
 0xc58   : > { %3252 = vtanh.f32 %v2118_v27  ;;  %v2982_v29 = vpop.f32.mrb[10].mxu0  ;;  %2995 = vmatmul.mubr.msk.f32.gmra.mrb[2].mxu1 %vm809_vm1, %v3243_v28 }
 0xc59   : > { %3254 = vtanh.f32 %v2123_v24  ;;  %v2133_v30 = vadd.f32 %v2982_v29, %v2718_v4  ;;  %v2127_v31 = vpop.f32.mrb[11].mxu0 }
 0xc5a   : > { %v3245_v32 = vpop.eup %3244  ;;  %v2128_v33 = vadd.f32 %v2718_v4, %v2127_v31 }
 0xc5b   : > { %v3247_v34 = vpop.eup %3246  ;;  %2997 = vmatprep.mubr.msk.f32.mxu1 %vm809_vm1, %v3245_v32 }
 0xc5c   : > { %3256 = vtanh.f32 %v2128_v33  ;;  %2998 = vmatmul.mubr.msk.f32.gmra.mrb[4].mxu1 %vm809_vm1, %v3247_v34 }
 0xc5d   : > { %3258 = vtanh.f32 %v2133_v30 }
 0xc5e   : > { %v3249_v35 = vpop.eup %3248 }
 0xc5f   : > { %v3251_v36 = vpop.eup %3250  ;;  %3000 = vmatprep.mubr.msk.f32.mxu1 %vm809_vm1, %v3249_v35 }
 0xc60   : > { %3001 = vmatmul.mubr.msk.f32.gmra.mrb[6].mxu1 %vm809_vm1, %v3251_v36 }
 0xc62   : > { %v3253_v37 = vpop.eup %3252 }
 0xc63   : > { %v3255_v38 = vpop.eup %3254  ;;  %3003 = vmatprep.mubr.msk.f32.mxu1 %vm809_vm1, %v3253_v37 }
 0xc64   : > { %3004 = vmatmul.mubr.msk.f32.gmra.mrb[8].mxu1 %vm809_vm1, %v3255_v38 }
 0xc66   : > { %v3257_v39 = vpop.eup %3256 }
 0xc67   : > { %v3259_v40 = vpop.eup %3258  ;;  %3006 = vmatprep.mubr.msk.f32.mxu1 %vm809_vm1, %v3257_v39 }
 0xc68   : > { %3007 = vmatmul.mubr.msk.f32.gmra.mrb[10].mxu1 %vm809_vm1, %v3259_v40 }
 0xd27   : > { %v2993_v42 = vpop.f32.mrb[0].mxu1 }
 0xd28   : > { %v2254_v43 = vpop.f32.mrb[1].mxu1  ;;  %v2315_v47 = vsel %vm2313_vm6, %v2993_v42, -inf }
 0xd29   : > { %v2314_v62 = vsel %vm2313_vm6, %v2254_v43, -inf }
 0xd2b   : > { %v2996_v44 = vpop.f32.mrb[2].mxu1 }
 0xd2c   : > { %v2264_v45 = vpop.f32.mrb[3].mxu1  ;;  %v2317_v3 = vsel %vm2313_vm6, %v2996_v44, -inf }
 0xd2d   : > { %v2316_v6 = vsel %vm2313_vm6, %v2264_v45, -inf }
 0xd2f   : > { %v2999_v46 = vpop.f32.mrb[4].mxu1 }
 0xd30   : > { %v2320_v48 = vsel %vm2313_vm6, %v2999_v46, -inf  ;;  %v2274_v50 = vpop.f32.mrb[5].mxu1 }
 0xd31   : > { %v2321_v63 = vmax.f32 %v2315_v47, %v2320_v48  ;;  %v2318_v0 = vsel %vm2313_vm6, %v2274_v50, -inf }
 0xd32   : > { %v2319_v1 = vmax.f32 %v2314_v62, %v2318_v0 }
 0xd33   : > { %v3002_v2 = vpop.f32.mrb[6].mxu1 }
 0xd34   : > { %v2324_v4 = vsel %vm2313_vm6, %v3002_v2, -inf  ;;  %v2284_v5 = vpop.f32.mrb[7].mxu1 }
 0xd35   : > { %v2325_v7 = vmax.f32 %v2317_v3, %v2324_v4  ;;  %v2322_v9 = vsel %vm2313_vm6, %v2284_v5, -inf }
 0xd36   : > { %v2323_v15 = vmax.f32 %v2316_v6, %v2322_v9 }
 0xd37   : > { %v3005_v8 = vpop.f32.mrb[8].mxu1 }
 0xd38   : > { %v2328_v10 = vsel %vm2313_vm6, %v3005_v8, -inf  ;;  %v2294_v11 = vpop.f32.mrb[9].mxu1 }
 0xd39   : > { %v2329_v12 = vmax.f32 %v2321_v63, %v2328_v10  ;;  %v2326_v13 = vsel %vm2313_vm6, %v2294_v11, -inf }
 0xd3a   : > { %v2327_v14 = vmax.f32 %v2319_v1, %v2326_v13 }
 0xd3b   : > { %v3008_v16 = vpop.f32.mrb[10].mxu1 }
 0xd3c   : > { %v2334_v17 = vmax.f32 %v2327_v14, %v2329_v12  ;;  %v2332_v18 = vsel %vm2313_vm6, %v3008_v16, -inf  ;;  %v2304_v19 = vpop.f32.mrb[11].mxu1 }
 0xd3d   : > { %v2333_v20 = vmax.f32 %v2325_v7, %v2332_v18  ;;  %v2330_v21 = vsel %vm2313_vm6, %v2304_v19, -inf }
 0xd3e   : > { %v2331_v22 = vmax.f32 %v2323_v15, %v2330_v21 }
 0xd40   : > { %v2335_v23 = vmax.f32 %v2331_v22, %v2333_v20 }
 0xd42   : > { %v2336_v24 = vmax.f32 %v2334_v17, %v2335_v23 }
 0xd44   : > { %v2347_v25 = vsub.f32 %v2304_v19, %v2336_v24  ;;  %v2337_v26 = vsub.f32 %v2254_v43, %v2336_v24  ;;  %v2338_v27 = vsub.f32 %v2993_v42, %v2336_v24  ;;  %v2339_v28 = vsub.f32 %v2264_v45, %v2336_v24 }
 0xd45   : > { %v2340_v29 = vsub.f32 %v2996_v44, %v2336_v24  ;;  %v2341_v30 = vsub.f32 %v2274_v50, %v2336_v24  ;;  %v2342_v31 = vsub.f32 %v2999_v46, %v2336_v24  ;;  %v2343_v32 = vsub.f32 %v2284_v5, %v2336_v24 }
 0xd46   : > { %v2344_v33 = vsub.f32 %v3002_v2, %v2336_v24  ;;  %v2345_v34 = vsub.f32 %v2294_v11, %v2336_v24  ;;  %v2346_v35 = vsub.f32 %v3005_v8, %v2336_v24  ;;  %v2348_v36 = vsub.f32 %v3008_v16, %v2336_v24 }
 0xd47   : > { %v2349_v37 = vmul.f32 1.442695, %v2337_v26  ;;  %v2351_v38 = vmul.f32 1.442695, %v2338_v27  ;;  %v2353_v39 = vmul.f32 1.442695, %v2339_v28 }
 0xd48   : > { %v2355_v40 = vmul.f32 1.442695, %v2340_v29  ;;  %v2357_v41 = vmul.f32 1.442695, %v2341_v30  ;;  %v2359_v43 = vmul.f32 1.442695, %v2342_v31 }
 0xd49   : > { %3260 = vpow2.f32 %v2349_v37  ;;  %v2361_v42 = vmul.f32 1.442695, %v2343_v32  ;;  %v2363_v44 = vmul.f32 1.442695, %v2344_v33  ;;  %v2365_v45 = vmul.f32 1.442695, %v2345_v34 }
 0xd4a   : > { %3262 = vpow2.f32 %v2351_v38  ;;  %v2367_v48 = vmul.f32 1.442695, %v2346_v35  ;;  %v2369_v1 = vmul.f32 1.442695, %v2347_v25  ;;  %v2371_v5 = vmul.f32 1.442695, %v2348_v36 }
 0xd4b   : > { %3264 = vpow2.f32 %v2353_v39 }
 0xd4c   : > { %3266 = vpow2.f32 %v2355_v40 }
 0xd4d   : > { %3268 = vpow2.f32 %v2357_v41 }
 0xd4e   : > { %3270 = vpow2.f32 %v2359_v43 }
 0xd4f   : > { %3272 = vpow2.f32 %v2361_v42 }
 0xd50   : > { %3274 = vpow2.f32 %v2363_v44 }
 0xd51   : > { %3276 = vpow2.f32 %v2365_v45  ;;  %v3434_v45 = vmov 0.0|0.0  }
 0xd52   : > { %3278 = vpow2.f32 %v2367_v48  ;;  %3123 = vmatprep.subr.bf16.mxu0 %v3434_v45 }
 0xd53   : > { %v3261_v46 = vpop.eup %3260  ;;  %3280 = vpow2.f32 %v2369_v1  ;;  %v2518_v1 = vld [vmem:[%s4154_s4 + $0x20] sm:$0xff] }
 0xd54   : > { %v3263_v47 = vpop.eup %3262  ;;  %v2373_v50 = vsel %vm2313_vm6, %v3261_v46, 0.0  ;;  %3282 = vpow2.f32 %v2371_v5  ;;  %v2521_v5 = vld [vmem:[%s4154_s4 + $0x38] sm:$0xff] }
 0xd55   : > { %v3265_v62 = vpop.eup %3264  ;;  %v2374_v63 = vsel %vm2313_vm6, %v3263_v47, 0.0 }
 0xd56   : > { %v3267_v0 = vpop.eup %3266  ;;  %v2375_v2 = vadd.f32 %v2374_v63, %v2373_v50  ;;  %v2376_v3 = vsel %vm2313_vm6, %v3265_v62, 0.0  ;;  %v2516_v50 = vld [vmem:[%s4154_s4 + $0x10] sm:$0xff] }
 0xd57   : > { %v3269_v4 = vpop.eup %3268  ;;  %v2378_v7 = vsel %vm2313_vm6, %v3267_v0, 0.0 }
 0xd58   : > { %v2377_v6 = vadd.f32 %v2376_v3, %v2375_v2  ;;  %v3271_v9 = vpop.eup %3270  ;;  %v2380_v8 = vsel %vm2313_vm6, %v3269_v4, 0.0  ;;  %v2519_v2 = vld [vmem:[%s4154_s4 + $0x28] sm:$0xff]  ;;  %v2520_v3 = vld [vmem:[%s4154_s4 + $0x30] sm:$0xff] }
 0xd59   : > { %v3273_v10 = vpop.eup %3272  ;;  %v2382_v12 = vsel %vm2313_vm6, %v3271_v9, 0.0 }
 0xd5a   : > { %v2379_v15 = vadd.f32 %v2378_v7, %v2377_v6  ;;  %v3275_v13 = vpop.eup %3274  ;;  %v2384_v16 = vsel %vm2313_vm6, %v3273_v10, 0.0  ;;  %v3133_v6 = vpack.c.bf16 %v2521_v5, %v2520_v3  ;;  %v3437_v7 = vmov 0.0  }
 0xd5b   : > { %v3277_v17 = vpop.eup %3276  ;;  %v2386_v19 = vsel %vm2313_vm6, %v3275_v13, 0.0  ;;  %3025 = vmatprep.mubr.msk.f32.mxu0 %vm3436_vm7, %v3437_v7 }
 0xd5c   : > { %v2381_v11 = vadd.f32 %v2380_v8, %v2379_v15  ;;  %v3279_v20 = vpop.eup %3278  ;;  %v2388_v22 = vsel %vm2313_vm6, %v3277_v17, 0.0 }
 0xd5d   : > { %v3281_v23 = vpop.eup %3280  ;;  %v2390_v25 = vsel %vm2313_vm6, %v3279_v20, 0.0 }
 0xd5e   : > { %v2383_v14 = vadd.f32 %v2382_v12, %v2381_v11  ;;  %v3283_v26 = vpop.eup %3282  ;;  %v2392_v28 = vsel %vm2313_vm6, %v3281_v23, 0.0 }
 0xd5f   : > { %v2394_v30 = vsel %vm2313_vm6, %v3283_v26, 0.0 }
 0xd60   : > { %v2385_v18 = vadd.f32 %v2384_v16, %v2383_v14 }
 0xd62   : > { %v2387_v21 = vadd.f32 %v2386_v19, %v2385_v18 }
 0xd64   : > { %v2389_v24 = vadd.f32 %v2388_v22, %v2387_v21 }
 0xd66   : > { %v2391_v27 = vadd.f32 %v2390_v25, %v2389_v24 }
 0xd68   : > { %v2393_v29 = vadd.f32 %v2392_v28, %v2391_v27 }
 0xd6a   : > { %v2395_v31 = vadd.f32 %v2394_v30, %v2393_v29 }
 0xd6c   : > { %3284 = vrcp.f32 %v2395_v31 }
 0xd76   : > { %v3285_v32 = vpop.eup %3284 }
 0xd77   : > { %v2399_v33 = vmul.f32 %v3285_v32, %v3265_v62  ;;  %v2397_v34 = vmul.f32 %v3285_v32, %v3261_v46  ;;  %v2400_v35 = vmul.f32 %v3285_v32, %v3267_v0  ;;  %v2398_v36 = vmul.f32 %v3285_v32, %v3263_v47  ;;  %v2514_v46 = vld [vmem:[%s4154_s4] sm:$0xff]  ;;  %v2515_v47 = vld [vmem:[%s4154_s4 + $0x8] sm:$0xff]  ;;  %v2517_v62 = vld [vmem:[%s4154_s4 + $0x18] sm:$0xff] }
 0xd78   : > { %v2402_v37 = vmul.f32 %v3285_v32, %v3271_v9  ;;  %v2401_v38 = vmul.f32 %v3285_v32, %v3269_v4  ;;  %v2404_v39 = vmul.f32 %v3285_v32, %v3275_v13  ;;  %v2403_v40 = vmul.f32 %v3285_v32, %v3273_v10  ;;  %v4024_v0 = vld [vmem:[%s4155_s28] sm:$0xff] }
 0xd79   : > { %2421 = vperm.xlu1 %3235, %v2399_v33   ;;  %2411 = vperm.xlu0 %3234, %v2397_v34   ;;  %v2406_v41 = vmul.f32 %v3285_v32, %v3279_v20  ;;  %v2405_v43 = vmul.f32 %v3285_v32, %v3277_v17  ;;  %v2408_v42 = vmul.f32 %v3285_v32, %v3283_v26 }
 0xd7a   : > { %v2407_v44 = vmul.f32 %v3285_v32, %v3281_v23  ;;  %v3124_v48 = vpack.c.bf16 %v2515_v47, %v2514_v46  ;;  %v3127_v63 = vpack.c.bf16 %v2517_v62, %v2516_v50  ;;  %v3130_v4 = vpack.c.bf16 %v2519_v2, %v2518_v1 }
 0xd7c   : > { %3125 = vmatpush3.bf16.msra.mxu0 %v3124_v48 }
 0xd7d   : > { %2426 = vperm.xlu1 %3235, %v2400_v35   ;;  %2416 = vperm.xlu0 %3234, %v2398_v36  }
 0xd7e   : > { %3126 = vmatprep.subr.bf16.mxu0 %v3434_v45 }
 0xd80   : > { %3128 = vmatpush3.bf16.msra.mxu0 %v3127_v63 }
 0xd81   : > { %2436 = vperm.xlu1 %3235, %v2402_v37   ;;  %2431 = vperm.xlu0 %3234, %v2401_v38  }
 0xd82   : > { %3129 = vmatprep.subr.bf16.mxu0 %v3434_v45 }
 0xd84   : > { %3131 = vmatpush3.bf16.msra.mxu0 %v3130_v4 }
 0xd85   : > { %2446 = vperm.xlu1 %3235, %v2404_v39   ;;  %2441 = vperm.xlu0 %3234, %v2403_v40  }
 0xd86   : > { %3132 = vmatprep.subr.bf16.mxu0 %v3434_v45 }
 0xd88   : > { %3134 = vmatpush3.bf16.msra.mxu0 %v3133_v6 }
 0xd89   : > { %2456 = vperm.xlu1 %3235, %v2406_v41   ;;  %2451 = vperm.xlu0 %3234, %v2405_v43  }
 0xd8d   : > { %2466 = vperm.xlu1 %3235, %v2408_v42   ;;  %2461 = vperm.xlu0 %3234, %v2407_v44  }
 0xd91   : > { %2510 = vperm.xlu0 %3234, %v4024_v0   ;;  %2504 = vrot.lane.b32.xlu1 %v3954_v61, %s3435_s3  ;;  %s4156_s3 = sld [smem:[#allocation30_spill]] }
 0xdf8   : > { %v2422_v9 = vpop.permute.xlu1 %2421  ;;  %v2412_v15 = vpop.permute.xlu0 %2411 }
 0xdf9   : > { %v2469_v8 = vmul.f32 %v2412_v15, %v3910_v49  ;;  %v2471_v12 = vmul.f32 %v2422_v9, %v3916_v52 }
 0xdfb   : > { %v2481_v14 = vsel %vm809_vm1, %v2469_v8, 0.0  ;;  %v2484_v21 = vsel %vm809_vm1, %v2471_v12, 0.0 }
 0xdfc   : > { %v2427_v10 = vpop.permute.xlu1 %2426  ;;  %v2417_v11 = vpop.permute.xlu0 %2416 }
 0xdfd   : > { %v2470_v13 = vmul.f32 %v2417_v11, %v3914_v51  ;;  %v2472_v16 = vmul.f32 %v2427_v10, %v3922_v53 }
 0xdff   : > { %v2482_v17 = vsel %vm809_vm1, %v2470_v13, 0.0  ;;  %v2486_v23 = vsel %vm809_vm1, %v2472_v16, 0.0 }
 0xe00   : > { %v2483_v18 = vadd.f32 %v2482_v17, %v2481_v14  ;;  %v2437_v19 = vpop.permute.xlu1 %2436  ;;  %v2432_v20 = vpop.permute.xlu0 %2431 }
 0xe01   : > { %v2473_v22 = vmul.f32 %v2432_v20, %v3924_v54  ;;  %v2474_v52 = vmul.f32 %v2437_v19, %v3930_v55 }
 0xe02   : > { %v2485_v49 = vadd.f32 %v2484_v21, %v2483_v18 }
 0xe03   : > { %v2488_v26 = vsel %vm809_vm1, %v2473_v22, 0.0  ;;  %v2490_v28 = vsel %vm809_vm1, %v2474_v52, 0.0 }
 0xe04   : > { %v2487_v24 = vadd.f32 %v2486_v23, %v2485_v49  ;;  %v2447_v51 = vpop.permute.xlu1 %2446  ;;  %v2442_v25 = vpop.permute.xlu0 %2441 }
 0xe05   : > { %v2475_v53 = vmul.f32 %v2442_v25, %v3932_v56  ;;  %v2476_v29 = vmul.f32 %v2447_v51, %v3938_v57 }
 0xe06   : > { %v2489_v27 = vadd.f32 %v2488_v26, %v2487_v24 }
 0xe07   : > { %v2492_v32 = vsel %vm809_vm1, %v2475_v53, 0.0  ;;  %v2494_v34 = vsel %vm809_vm1, %v2476_v29, 0.0 }
 0xe08   : > { %v2491_v30 = vadd.f32 %v2490_v28, %v2489_v27  ;;  %v2457_v31 = vpop.permute.xlu1 %2456  ;;  %v2452_v54 = vpop.permute.xlu0 %2451 }
 0xe09   : > { %v2477_v33 = vmul.f32 %v2452_v54, %v3940_v58  ;;  %v2478_v35 = vmul.f32 %v2457_v31, %v3946_v59 }
 0xe0a   : > { %v2493_v55 = vadd.f32 %v2492_v32, %v2491_v30 }
 0xe0b   : > { %v2496_v38 = vsel %vm809_vm1, %v2477_v33, 0.0  ;;  %v2498_v40 = vsel %vm809_vm1, %v2478_v35, 0.0 }
 0xe0c   : > { %v2495_v36 = vadd.f32 %v2494_v34, %v2493_v55  ;;  %v2467_v37 = vpop.permute.xlu1 %2466  ;;  %v2462_v56 = vpop.permute.xlu0 %2461 }
 0xe0d   : > { %v2479_v39 = vmul.f32 %v2462_v56, %v3948_v60  ;;  %v2480_v41 = vmul.f32 %v2467_v37, %v3954_v61  ;;  %v2743_v60 = vld [vmem:[#allocation4] ss:$0 sm:$0xff] }
 0xe0e   : > { %v2497_v57 = vadd.f32 %v2496_v38, %v2495_v36 }
 0xe0f   : > { %v2500_v58 = vsel %vm809_vm1, %v2479_v39, 0.0  ;;  %v2502_v44 = vsel %vm809_vm1, %v2480_v41, 0.0 }
 0xe10   : > { %v2499_v43 = vadd.f32 %v2498_v40, %v2497_v57  ;;  %v2505_v45 = vpop.permute.xlu1 %2504  ;;  %v2511_v46 = vpop.permute.xlu0 %2510 }
 0xe12   : > { %v2501_v42 = vadd.f32 %v2500_v58, %v2499_v43 }
 0xe14   : > { %v2503_v59 = vadd.f32 %v2502_v44, %v2501_v42 }
 0xe16   : > { %v2507_v47 = vsel %vm809_vm1, %v2503_v59, %v2505_v45 }
 0xe17   : > { %v2513_v48 = vmul.f32 %v2511_v46, %v2507_v47 }
 0xe19   : > { %3026 = vmatmul.mubr.msk.f32.vlgmr.msra.gmra.mrb[12].mxu0 %vm1740_vm4, %v2513_v48 }
 0xeec   : > { %v2598_v50 = vpop.f32.mrb[12].mxu0 }
 0xeed   : > { %v2599_v62 = vadd.f32 %v2743_v60, %v2598_v50  ;;  %v3027_v63 = vpop.f32.mrb[13].mxu0 }
 0xeef   : > { %v2745_v1 = vmul.f32 -1.442695, %v2599_v62 }
 0xef1   : > { %3286 = vpow2.f32 %v2745_v1 }
 0xefb   : > { %v3287_v61 = vpop.eup %3286 }
 0xefc   : > { %v2605_v2 = vadd.f32 1.0, %v3287_v61 }
 0xefe   : > { %3288 = vrcp.f32 %v2605_v2 }
 0xf08   : > { %v3289_v3 = vpop.eup %3288 }
 0xf09   : > { %v2608_v4 = vmul.f32 %v3289_v3, %v4024_v0 }
 0xf0b   : > { %2609 = vst.msk [vmem:[%s4156_s3] sm:$0xff] %vm2313_vm6, %v2608_v4 }
 0xf0c PF: > { %s4157_s30 = sld [smem:[#allocation15_spill]] }
 0xf12   : > { %s40_s6 = sadd.s32 1, %s4157_s30  }
 0xf13   : > { %p37_p9 = scmp.ge.s32.totalorder %s40_s6, 14  }
 0xf15   :  { %39 = sbr.rel (!%p37_p9) target bundleno = 19 (0x13), region = 169 }
 0xf1c   :  { %2621 = vsyncpa [#allocation6], 1 }
 0xf1d   :  { %2623 = vsyncpa [#allocation6 + $0x1], 1 }
 0xf1e   :  { %2624 = vsyncpa [#allocation8], 1 }
 0xf1f   :  { %2625 = vsyncpa [#allocation11], 1 }

</bundles_post_ra>
